<compile_context>
chip_gen: v7x
topology: tpu7x:2x2x1
jax: 0.10.0
libtpu: 0.0.40
codegen_flags: <defaults>
</compile_context>

<pallas_src>
import functools

import jax
import jax.numpy as jnp
from jax import lax
from jax.experimental import pallas as pl
from jax.experimental.pallas import tpu as pltpu


# ----------------------------------------------------------------------------
# Fused multi-layer LSTM kernel: one grid step, everything resident in VMEM.
# ----------------------------------------------------------------------------
def _fused_lstm_kernel(*refs, num_layers, seq_len, batch, hidden_size):
    """Ref order:
      inputs : gx0   (T*B, 4H)   -- precomputed x @ W_ih0^T + (b_ih0 + b_hh0)
               h0    (L, B, H), c0 (L, B, H)
               whh_l^T (H, 4H)    for l = 0..L-1
               wih_l^T (H, 4H)    for l = 1..L-1
               b_l     (1, 4H)    for l = 1..L-1
      outputs: y     (B, T*H)     -- lane-dense; y[:, t*H:(t+1)*H] = h_t (last layer)
               state (B, 2*L*H)   -- lane-dense; [h_0..h_{L-1}, c_0..c_{L-1}]
      scratch: h_stage (T*B, H) f32 VMEM -- stages a layer's outputs so the
               next layer's input projection is a single batched GEMM.
    """
    L, T, B, H = num_layers, seq_len, batch, hidden_size
    gx0_ref, h0_ref, c0_ref = refs[0:3]
    whh_refs = refs[3:3 + L]
    wih_refs = refs[3 + L:3 + 2 * L - 1]
    b_refs = refs[3 + 2 * L - 1:3 * L + 1]
    y_ref, state_ref = refs[3 * L + 1:3 * L + 3]
    h_stage = refs[3 * L + 3]

    # Layer-0 batched input projection was already done in the wrapper.
    gx_all = gx0_ref[...].astype(jnp.float32)            # (T*B, 4H)

    for l in range(L):
        h = h0_ref[l].astype(jnp.float32)                 # (B, H)
        c = c0_ref[l].astype(jnp.float32)                 # (B, H)
        whh = whh_refs[l][...]                            # (H, 4H)
        last = (l == L - 1)

        # T is small & static here: fully unrolled Python loop keeps every
        # slice static and gives the LLO scheduler full visibility.
        for t in range(T):
            gx = gx_all[t * B:(t + 1) * B, :]             # (B, 4H), off-chain
            gates = gx + jnp.dot(h, whh, preferred_element_type=jnp.float32)
            # PyTorch gate order: i, f, g, o.
            # One full-tile sigmoid covers i/f/o; tanh only on the g slice
            # (at production shapes this is strictly fewer EUP vregs than a
            #  full-tile tanh).  H=32 < 128 lanes here -> sub-lane slices;
            # choose H as a multiple of 128 for production.
            sig = jax.nn.sigmoid(gates)                   # (B, 4H)
            i_g = sig[:, 0 * H:1 * H]
            f_g = sig[:, 1 * H:2 * H]
            o_g = sig[:, 3 * H:4 * H]
            g_g = jnp.tanh(gates[:, 2 * H:3 * H])
            c = f_g * c + i_g * g_g
            h = o_g * jnp.tanh(c)
            if last:
                # Lane-dense output slab: column block t of (B, T*H).
                y_ref[:, t * H:(t + 1) * H] = h.astype(y_ref.dtype)
            else:
                # Stage for the next layer's batched input projection.
                h_stage[t * B:(t + 1) * B, :] = h

        # Final states written exactly once per layer, into the lane-dense
        # (B, 2*L*H) slab: h in block l, c in block L + l.
        state_ref[:, l * H:(l + 1) * H] = h.astype(state_ref.dtype)
        state_ref[:, (L + l) * H:(L + l + 1) * H] = c.astype(state_ref.dtype)

        if not last:
            # Hoisted inter-layer input projection: ONE (T*B,H)@(H,4H) GEMM
            # instead of T small matmuls inside the next layer's serial loop.
            wih = wih_refs[l][...]                        # layer l+1 weights
            b = b_refs[l][...]                            # (1, 4H)
            gx_all = (jnp.dot(h_stage[...], wih,
                              preferred_element_type=jnp.float32) + b)


# ----------------------------------------------------------------------------
# Wrapper
# ----------------------------------------------------------------------------
def prepare_params(raw_params):
    """One-time parameter prep: transpose weights to (in_dim, 4H), fuse biases."""
    prepped = []
    for (w_ih, w_hh, b_ih, b_hh) in raw_params:
        prepped.append((jnp.transpose(w_ih),             # (in_dim, 4H)
                        jnp.transpose(w_hh),             # (H, 4H)
                        (b_ih + b_hh).reshape(1, -1)))   # (1, 4H)
    return prepped


def rnndni_forward(x, hidden, prepped_params):
    """x: [T, B, input_size] (batch_first=False); hidden = (h0, c0), each [L, B, H]."""
    h0, c0 = hidden
    L, B, H = h0.shape
    T = x.shape[0]

    wih0_t, _, b0 = prepped_params[0]
    # Layer-0 input projection for all timesteps as one MXU-friendly GEMM,
    # off the serial critical path.  Shape (T*B, 4H).
    gx0 = jnp.dot(x.reshape(T * B, -1), wih0_t,
                  preferred_element_type=jnp.float32) + b0

    whh_list = [p[1] for p in prepped_params]
    wih_list = [p[0] for p in prepped_params[1:]]
    b_list = [p[2] for p in prepped_params[1:]]

    kernel = functools.partial(_fused_lstm_kernel, num_layers=L, seq_len=T,
                               batch=B, hidden_size=H)

    in_specs = [
        pl.BlockSpec((T * B, 4 * H), lambda i: (0, 0)),     # gx0
        pl.BlockSpec((L, B, H), lambda i: (0, 0, 0)),       # h0
        pl.BlockSpec((L, B, H), lambda i: (0, 0, 0)),       # c0
    ]
    in_specs += [pl.BlockSpec((H, 4 * H), lambda i: (0, 0)) for _ in whh_list]
    in_specs += [pl.BlockSpec((H, 4 * H), lambda i: (0, 0)) for _ in wih_list]
    in_specs += [pl.BlockSpec((1, 4 * H), lambda i: (0, 0)) for _ in b_list]

    # Lane-dense output slabs (last dims are multiples of 128): avoids masked
    # partial stores / padded writeback DMAs.  Reshaped in the wrapper below.
    out_specs = [
        pl.BlockSpec((B, T * H), lambda i: (0, 0)),          # y slab
        pl.BlockSpec((B, 2 * L * H), lambda i: (0, 0)),      # (h_N, c_N) slab
    ]

    grid_spec = pltpu.PrefetchScalarGridSpec(
        num_scalar_prefetch=0,
        grid=(1,),                       # recurrence lives inside the kernel
        in_specs=in_specs,
        out_specs=out_specs,
        scratch_shapes=[pltpu.VMEM((T * B, H), jnp.float32)],   # h_stage
    )

    y_flat, state_flat = pl.pallas_call(
        kernel,
        out_shape=(
            jax.ShapeDtypeStruct((B, T * H), x.dtype),
            jax.ShapeDtypeStruct((B, 2 * L * H), h0.dtype),
        ),
        grid_spec=grid_spec,
        compiler_params=pltpu.CompilerParams(
            dimension_semantics=("arbitrary",),
            vmem_limit_bytes=32 * 1024 * 1024),
    )(gx0, h0, c0, *whh_list, *wih_list, *b_list)

    # Layout plumbing back to PyTorch conventions (pure reshape/transpose).
    y = jnp.transpose(y_flat.reshape(B, T, H), (1, 0, 2))          # (T, B, H)
    state = jnp.transpose(state_flat.reshape(B, 2 * L, H), (1, 0, 2))
    hn, cn = state[:L], state[L:]                                   # (L, B, H)
    return y, (hn, cn)


# ----------------------------------------------------------------------------
# Pure-JAX reference (lax.scan) for correctness check.
# ----------------------------------------------------------------------------
def _lstm_layer_ref(x, h0, c0, w_ih, w_hh, b_ih, b_hh):
    H = h0.shape[-1]
    wih_t = w_ih.T
    whh_t = w_hh.T
    b = b_ih + b_hh

    def cell(carry, x_t):
        h, c = carry
        gates = x_t @ wih_t + h @ whh_t + b
        i_g = jax.nn.sigmoid(gates[:, 0 * H:1 * H])
        f_g = jax.nn.sigmoid(gates[:, 1 * H:2 * H])
        g_g = jnp.tanh(gates[:, 2 * H:3 * H])
        o_g = jax.nn.sigmoid(gates[:, 3 * H:4 * H])
        c_new = f_g * c + i_g * g_g
        h_new = o_g * jnp.tanh(c_new)
        return (h_new, c_new), h_new

    (hn, cn), y = lax.scan(cell, (h0, c0), x)
    return y, hn, cn


def rnndni_forward_ref(x, hidden, params):
    h0, c0 = hidden
    layer_in = x
    hn_list, cn_list = [], []
    for layer in range(h0.shape[0]):
        layer_in, hn, cn = _lstm_layer_ref(layer_in, h0[layer], c0[layer],
                                           *params[layer])
        hn_list.append(hn)
        cn_list.append(cn)
    return layer_in, (jnp.stack(hn_list), jnp.stack(cn_list))


# ----------------------------------------------------------------------------
# Main
# ----------------------------------------------------------------------------
if __name__ == "__main__":
    # Small shapes consistent with RNNdni(LSTM): seq=8, batch=2,
    # input_size=16, hidden_size=32, num_layers=2, batch_first=False.
    T, B, I, H, L = 8, 2, 16, 32, 2

    key = jax.random.PRNGKey(0)
    bound = 1.0 / jnp.sqrt(jnp.float32(H))   # PyTorch LSTM default init range

    params = []
    for layer in range(L):
        in_dim = I if layer == 0 else H
        key, k1, k2, k3, k4 = jax.random.split(key, 5)
        w_ih = jax.random.uniform(k1, (4 * H, in_dim), jnp.float32, -bound, bound)
        w_hh = jax.random.uniform(k2, (4 * H, H), jnp.float32, -bound, bound)
        b_ih = jax.random.uniform(k3, (4 * H,), jnp.float32, -bound, bound)
        b_hh = jax.random.uniform(k4, (4 * H,), jnp.float32, -bound, bound)
        params.append((w_ih, w_hh, b_ih, b_hh))

    key, kx, kh, kc = jax.random.split(key, 4)
    x = jax.random.normal(kx, (T, B, I), jnp.float32)
    h0 = jax.random.normal(kh, (L, B, H), jnp.float32)
    c0 = jax.random.normal(kc, (L, B, H), jnp.float32)

    # One-time parameter preparation (transposes + fused biases).
    prepped = prepare_params(params)

    output, (hn, cn) = rnndni_forward(x, (h0, c0), prepped)
    output = jax.block_until_ready(output)
    hn = jax.block_until_ready(hn)
    cn = jax.block_until_ready(cn)

    # Correctness check against pure-JAX reference.
    out_ref, (hn_ref, cn_ref) = rnndni_forward_ref(x, (h0, c0), params)
    assert output.shape == (T, B, H) and hn.shape == (L, B, H) and cn.shape == (L, B, H)
    assert jnp.allclose(output, out_ref, atol=1e-5, rtol=1e-5)
    assert jnp.allclose(hn, hn_ref, atol=1e-5, rtol=1e-5)
    assert jnp.allclose(cn, cn_ref, atol=1e-5, rtol=1e-5)

    print("KERNEL_OK")
</pallas_src>

<mosaic_0001>
module attributes {stable_mosaic.version = 11 : i64} {
  func.func @_fused_lstm_kernel(%arg0: i32, %arg1: memref<16x128xf32, #tpu.memory_space<vmem>>, %arg2: memref<2x2x32xf32, #tpu.memory_space<vmem>>, %arg3: memref<2x2x32xf32, #tpu.memory_space<vmem>>, %arg4: memref<32x128xf32, #tpu.memory_space<vmem>>, %arg5: memref<32x128xf32, #tpu.memory_space<vmem>>, %arg6: memref<32x128xf32, #tpu.memory_space<vmem>>, %arg7: memref<1x128xf32, #tpu.memory_space<vmem>>, %arg8: memref<2x256xf32, #tpu.memory_space<vmem>>, %arg9: memref<2x128xf32, #tpu.memory_space<vmem>>, %arg10: memref<16x32xf32, #tpu.memory_space<vmem>>) attributes {dimension_semantics = [#tpu.dimension_semantics<arbitrary>], iteration_bounds = array<i64: 1>, scalar_prefetch = 0 : i64, scratch_operands = 1 : i64, tpu.core_type = #tpu.core_type<tc>, window_params = [{pipeline_mode = #tpu.pipeline_mode<synchronous>, transform_indices = @transform_0, window_bounds = array<i64: 16, 128>}, {pipeline_mode = #tpu.pipeline_mode<synchronous>, transform_indices = @transform_1, window_bounds = array<i64: 2, 2, 32>}, {pipeline_mode = #tpu.pipeline_mode<synchronous>, transform_indices = @transform_2, window_bounds = array<i64: 2, 2, 32>}, {pipeline_mode = #tpu.pipeline_mode<synchronous>, transform_indices = @transform_3, window_bounds = array<i64: 32, 128>}, {pipeline_mode = #tpu.pipeline_mode<synchronous>, transform_indices = @transform_4, window_bounds = array<i64: 32, 128>}, {pipeline_mode = #tpu.pipeline_mode<synchronous>, transform_indices = @transform_5, window_bounds = array<i64: 32, 128>}, {pipeline_mode = #tpu.pipeline_mode<synchronous>, transform_indices = @transform_6, window_bounds = array<i64: 1, 128>}, {pipeline_mode = #tpu.pipeline_mode<synchronous>, transform_indices = @transform_7, window_bounds = array<i64: 2, 256>}, {pipeline_mode = #tpu.pipeline_mode<synchronous>, transform_indices = @transform_8, window_bounds = array<i64: 2, 128>}]} {
    %c0 = arith.constant 0 : index
    %c0_0 = arith.constant 0 : index
    %0 = vector.load %arg1[%c0, %c0_0] : memref<16x128xf32, #tpu.memory_space<vmem>>, vector<16x128xf32>
    %c0_1 = arith.constant 0 : index
    %c0_2 = arith.constant 0 : index
    %c0_3 = arith.constant 0 : index
    %1 = vector.load %arg2[%c0_1, %c0_2, %c0_3] : memref<2x2x32xf32, #tpu.memory_space<vmem>>, vector<1x2x32xf32>
    %2 = vector.shape_cast %1 : vector<1x2x32xf32> to vector<2x32xf32>
    %c0_4 = arith.constant 0 : index
    %c0_5 = arith.constant 0 : index
    %c0_6 = arith.constant 0 : index
    %3 = vector.load %arg3[%c0_4, %c0_5, %c0_6] : memref<2x2x32xf32, #tpu.memory_space<vmem>>, vector<1x2x32xf32>
    %4 = vector.shape_cast %3 : vector<1x2x32xf32> to vector<2x32xf32>
    %c0_7 = arith.constant 0 : index
    %c0_8 = arith.constant 0 : index
    %5 = vector.load %arg4[%c0_7, %c0_8] : memref<32x128xf32, #tpu.memory_space<vmem>>, vector<32x128xf32>
    %6 = vector.extract_strided_slice %0 {offsets = [0, 0], sizes = [2, 128], strides = [1, 1]} : vector<16x128xf32> to vector<2x128xf32>
    %cst = arith.constant dense<0.000000e+00> : vector<2x128xf32>
    %7 = tpu.matmul %2, %5, %cst {dimension_numbers = #tpu.dot_dimension_numbers<[1], [0], [0], [1], [0, 0, 1, 1], [], []>} : vector<2x32xf32>, vector<32x128xf32>, vector<2x128xf32> -> vector<2x128xf32>
    %8 = arith.addf %6, %7 : vector<2x128xf32>
    %9 = arith.negf %8 : vector<2x128xf32>
    %10 = math.exp %9 : vector<2x128xf32>
    %cst_9 = arith.constant 1.000000e+00 : f32
    %11 = vector.broadcast %cst_9 : f32 to vector<2x128xf32>
    %12 = arith.addf %11, %10 : vector<2x128xf32>
    %13 = arith.divf %11, %12 : vector<2x128xf32>
    %14 = vector.extract_strided_slice %13 {offsets = [0, 0], sizes = [2, 32], strides = [1, 1]} : vector<2x128xf32> to vector<2x32xf32>
    %15 = vector.extract_strided_slice %13 {offsets = [0, 32], sizes = [2, 32], strides = [1, 1]} : vector<2x128xf32> to vector<2x32xf32>
    %16 = vector.extract_strided_slice %13 {offsets = [0, 96], sizes = [2, 32], strides = [1, 1]} : vector<2x128xf32> to vector<2x32xf32>
    %17 = vector.extract_strided_slice %8 {offsets = [0, 64], sizes = [2, 32], strides = [1, 1]} : vector<2x128xf32> to vector<2x32xf32>
    %18 = math.tanh %17 : vector<2x32xf32>
    %19 = arith.mulf %15, %4 : vector<2x32xf32>
    %20 = arith.mulf %14, %18 : vector<2x32xf32>
    %21 = arith.addf %19, %20 : vector<2x32xf32>
    %22 = math.tanh %21 : vector<2x32xf32>
    %23 = arith.mulf %16, %22 : vector<2x32xf32>
    %c0_10 = arith.constant 0 : index
    %c0_11 = arith.constant 0 : index
    %24 = vector.load %arg10[%c0_10, %c0_11] : memref<16x32xf32, #tpu.memory_space<vmem>>, vector<2x32xf32>
    tpu.vector_store %arg10[%c0_10, %c0_11], %23 {strides = array<i32>} : memref<16x32xf32, #tpu.memory_space<vmem>>, vector<2x32xf32>,
    %25 = vector.extract_strided_slice %0 {offsets = [2, 0], sizes = [2, 128], strides = [1, 1]} : vector<16x128xf32> to vector<2x128xf32>
    %cst_12 = arith.constant dense<0.000000e+00> : vector<2x128xf32>
    %26 = tpu.matmul %23, %5, %cst_12 {dimension_numbers = #tpu.dot_dimension_numbers<[1], [0], [0], [1], [0, 0, 1, 1], [], []>} : vector<2x32xf32>, vector<32x128xf32>, vector<2x128xf32> -> vector<2x128xf32>
    %27 = arith.addf %25, %26 : vector<2x128xf32>
    %28 = arith.negf %27 : vector<2x128xf32>
    %29 = math.exp %28 : vector<2x128xf32>
    %cst_13 = arith.constant 1.000000e+00 : f32
    %30 = vector.broadcast %cst_13 : f32 to vector<2x128xf32>
    %31 = arith.addf %30, %29 : vector<2x128xf32>
    %32 = arith.divf %30, %31 : vector<2x128xf32>
    %33 = vector.extract_strided_slice %32 {offsets = [0, 0], sizes = [2, 32], strides = [1, 1]} : vector<2x128xf32> to vector<2x32xf32>
    %34 = vector.extract_strided_slice %32 {offsets = [0, 32], sizes = [2, 32], strides = [1, 1]} : vector<2x128xf32> to vector<2x32xf32>
    %35 = vector.extract_strided_slice %32 {offsets = [0, 96], sizes = [2, 32], strides = [1, 1]} : vector<2x128xf32> to vector<2x32xf32>
    %36 = vector.extract_strided_slice %27 {offsets = [0, 64], sizes = [2, 32], strides = [1, 1]} : vector<2x128xf32> to vector<2x32xf32>
    %37 = math.tanh %36 : vector<2x32xf32>
    %38 = arith.mulf %34, %21 : vector<2x32xf32>
    %39 = arith.mulf %33, %37 : vector<2x32xf32>
    %40 = arith.addf %38, %39 : vector<2x32xf32>
    %41 = math.tanh %40 : vector<2x32xf32>
    %42 = arith.mulf %35, %41 : vector<2x32xf32>
    %c2 = arith.constant 2 : index
    %c0_14 = arith.constant 0 : index
    %43 = vector.load %arg10[%c2, %c0_14] : memref<16x32xf32, #tpu.memory_space<vmem>>, vector<2x32xf32>
    tpu.vector_store %arg10[%c2, %c0_14], %42 {strides = array<i32>} : memref<16x32xf32, #tpu.memory_space<vmem>>, vector<2x32xf32>,
    %44 = vector.extract_strided_slice %0 {offsets = [4, 0], sizes = [2, 128], strides = [1, 1]} : vector<16x128xf32> to vector<2x128xf32>
    %cst_15 = arith.constant dense<0.000000e+00> : vector<2x128xf32>
    %45 = tpu.matmul %42, %5, %cst_15 {dimension_numbers = #tpu.dot_dimension_numbers<[1], [0], [0], [1], [0, 0, 1, 1], [], []>} : vector<2x32xf32>, vector<32x128xf32>, vector<2x128xf32> -> vector<2x128xf32>
    %46 = arith.addf %44, %45 : vector<2x128xf32>
    %47 = arith.negf %46 : vector<2x128xf32>
    %48 = math.exp %47 : vector<2x128xf32>
    %cst_16 = arith.constant 1.000000e+00 : f32
    %49 = vector.broadcast %cst_16 : f32 to vector<2x128xf32>
    %50 = arith.addf %49, %48 : vector<2x128xf32>
    %51 = arith.divf %49, %50 : vector<2x128xf32>
    %52 = vector.extract_strided_slice %51 {offsets = [0, 0], sizes = [2, 32], strides = [1, 1]} : vector<2x128xf32> to vector<2x32xf32>
    %53 = vector.extract_strided_slice %51 {offsets = [0, 32], sizes = [2, 32], strides = [1, 1]} : vector<2x128xf32> to vector<2x32xf32>
    %54 = vector.extract_strided_slice %51 {offsets = [0, 96], sizes = [2, 32], strides = [1, 1]} : vector<2x128xf32> to vector<2x32xf32>
    %55 = vector.extract_strided_slice %46 {offsets = [0, 64], sizes = [2, 32], strides = [1, 1]} : vector<2x128xf32> to vector<2x32xf32>
    %56 = math.tanh %55 : vector<2x32xf32>
    %57 = arith.mulf %53, %40 : vector<2x32xf32>
    %58 = arith.mulf %52, %56 : vector<2x32xf32>
    %59 = arith.addf %57, %58 : vector<2x32xf32>
    %60 = math.tanh %59 : vector<2x32xf32>
    %61 = arith.mulf %54, %60 : vector<2x32xf32>
    %c4 = arith.constant 4 : index
    %c0_17 = arith.constant 0 : index
    %62 = vector.load %arg10[%c4, %c0_17] : memref<16x32xf32, #tpu.memory_space<vmem>>, vector<2x32xf32>
    tpu.vector_store %arg10[%c4, %c0_17], %61 {strides = array<i32>} : memref<16x32xf32, #tpu.memory_space<vmem>>, vector<2x32xf32>,
    %63 = vector.extract_strided_slice %0 {offsets = [6, 0], sizes = [2, 128], strides = [1, 1]} : vector<16x128xf32> to vector<2x128xf32>
    %cst_18 = arith.constant dense<0.000000e+00> : vector<2x128xf32>
    %64 = tpu.matmul %61, %5, %cst_18 {dimension_numbers = #tpu.dot_dimension_numbers<[1], [0], [0], [1], [0, 0, 1, 1], [], []>} : vector<2x32xf32>, vector<32x128xf32>, vector<2x128xf32> -> vector<2x128xf32>
    %65 = arith.addf %63, %64 : vector<2x128xf32>
    %66 = arith.negf %65 : vector<2x128xf32>
    %67 = math.exp %66 : vector<2x128xf32>
    %cst_19 = arith.constant 1.000000e+00 : f32
    %68 = vector.broadcast %cst_19 : f32 to vector<2x128xf32>
    %69 = arith.addf %68, %67 : vector<2x128xf32>
    %70 = arith.divf %68, %69 : vector<2x128xf32>
    %71 = vector.extract_strided_slice %70 {offsets = [0, 0], sizes = [2, 32], strides = [1, 1]} : vector<2x128xf32> to vector<2x32xf32>
    %72 = vector.extract_strided_slice %70 {offsets = [0, 32], sizes = [2, 32], strides = [1, 1]} : vector<2x128xf32> to vector<2x32xf32>
    %73 = vector.extract_strided_slice %70 {offsets = [0, 96], sizes = [2, 32], strides = [1, 1]} : vector<2x128xf32> to vector<2x32xf32>
    %74 = vector.extract_strided_slice %65 {offsets = [0, 64], sizes = [2, 32], strides = [1, 1]} : vector<2x128xf32> to vector<2x32xf32>
    %75 = math.tanh %74 : vector<2x32xf32>
    %76 = arith.mulf %72, %59 : vector<2x32xf32>
    %77 = arith.mulf %71, %75 : vector<2x32xf32>
    %78 = arith.addf %76, %77 : vector<2x32xf32>
    %79 = math.tanh %78 : vector<2x32xf32>
    %80 = arith.mulf %73, %79 : vector<2x32xf32>
    %c6 = arith.constant 6 : index
    %c0_20 = arith.constant 0 : index
    %81 = vector.load %arg10[%c6, %c0_20] : memref<16x32xf32, #tpu.memory_space<vmem>>, vector<2x32xf32>
    tpu.vector_store %arg10[%c6, %c0_20], %80 {strides = array<i32>} : memref<16x32xf32, #tpu.memory_space<vmem>>, vector<2x32xf32>,
    %82 = vector.extract_strided_slice %0 {offsets = [8, 0], sizes = [2, 128], strides = [1, 1]} : vector<16x128xf32> to vector<2x128xf32>
    %cst_21 = arith.constant dense<0.000000e+00> : vector<2x128xf32>
    %83 = tpu.matmul %80, %5, %cst_21 {dimension_numbers = #tpu.dot_dimension_numbers<[1], [0], [0], [1], [0, 0, 1, 1], [], []>} : vector<2x32xf32>, vector<32x128xf32>, vector<2x128xf32> -> vector<2x128xf32>
    %84 = arith.addf %82, %83 : vector<2x128xf32>
    %85 = arith.negf %84 : vector<2x128xf32>
    %86 = math.exp %85 : vector<2x128xf32>
    %cst_22 = arith.constant 1.000000e+00 : f32
    %87 = vector.broadcast %cst_22 : f32 to vector<2x128xf32>
    %88 = arith.addf %87, %86 : vector<2x128xf32>
    %89 = arith.divf %87, %88 : vector<2x128xf32>
    %90 = vector.extract_strided_slice %89 {offsets = [0, 0], sizes = [2, 32], strides = [1, 1]} : vector<2x128xf32> to vector<2x32xf32>
    %91 = vector.extract_strided_slice %89 {offsets = [0, 32], sizes = [2, 32], strides = [1, 1]} : vector<2x128xf32> to vector<2x32xf32>
    %92 = vector.extract_strided_slice %89 {offsets = [0, 96], sizes = [2, 32], strides = [1, 1]} : vector<2x128xf32> to vector<2x32xf32>
    %93 = vector.extract_strided_slice %84 {offsets = [0, 64], sizes = [2, 32], strides = [1, 1]} : vector<2x128xf32> to vector<2x32xf32>
    %94 = math.tanh %93 : vector<2x32xf32>
    %95 = arith.mulf %91, %78 : vector<2x32xf32>
    %96 = arith.mulf %90, %94 : vector<2x32xf32>
    %97 = arith.addf %95, %96 : vector<2x32xf32>
    %98 = math.tanh %97 : vector<2x32xf32>
    %99 = arith.mulf %92, %98 : vector<2x32xf32>
    %c8 = arith.constant 8 : index
    %c0_23 = arith.constant 0 : index
    %100 = vector.load %arg10[%c8, %c0_23] : memref<16x32xf32, #tpu.memory_space<vmem>>, vector<2x32xf32>
    tpu.vector_store %arg10[%c8, %c0_23], %99 {strides = array<i32>} : memref<16x32xf32, #tpu.memory_space<vmem>>, vector<2x32xf32>,
    %101 = vector.extract_strided_slice %0 {offsets = [10, 0], sizes = [2, 128], strides = [1, 1]} : vector<16x128xf32> to vector<2x128xf32>
    %cst_24 = arith.constant dense<0.000000e+00> : vector<2x128xf32>
    %102 = tpu.matmul %99, %5, %cst_24 {dimension_numbers = #tpu.dot_dimension_numbers<[1], [0], [0], [1], [0, 0, 1, 1], [], []>} : vector<2x32xf32>, vector<32x128xf32>, vector<2x128xf32> -> vector<2x128xf32>
    %103 = arith.addf %101, %102 : vector<2x128xf32>
    %104 = arith.negf %103 : vector<2x128xf32>
    %105 = math.exp %104 : vector<2x128xf32>
    %cst_25 = arith.constant 1.000000e+00 : f32
    %106 = vector.broadcast %cst_25 : f32 to vector<2x128xf32>
    %107 = arith.addf %106, %105 : vector<2x128xf32>
    %108 = arith.divf %106, %107 : vector<2x128xf32>
    %109 = vector.extract_strided_slice %108 {offsets = [0, 0], sizes = [2, 32], strides = [1, 1]} : vector<2x128xf32> to vector<2x32xf32>
    %110 = vector.extract_strided_slice %108 {offsets = [0, 32], sizes = [2, 32], strides = [1, 1]} : vector<2x128xf32> to vector<2x32xf32>
    %111 = vector.extract_strided_slice %108 {offsets = [0, 96], sizes = [2, 32], strides = [1, 1]} : vector<2x128xf32> to vector<2x32xf32>
    %112 = vector.extract_strided_slice %103 {offsets = [0, 64], sizes = [2, 32], strides = [1, 1]} : vector<2x128xf32> to vector<2x32xf32>
    %113 = math.tanh %112 : vector<2x32xf32>
    %114 = arith.mulf %110, %97 : vector<2x32xf32>
    %115 = arith.mulf %109, %113 : vector<2x32xf32>
    %116 = arith.addf %114, %115 : vector<2x32xf32>
    %117 = math.tanh %116 : vector<2x32xf32>
    %118 = arith.mulf %111, %117 : vector<2x32xf32>
    %c10 = arith.constant 10 : index
    %c0_26 = arith.constant 0 : index
    %119 = vector.load %arg10[%c10, %c0_26] : memref<16x32xf32, #tpu.memory_space<vmem>>, vector<2x32xf32>
    tpu.vector_store %arg10[%c10, %c0_26], %118 {strides = array<i32>} : memref<16x32xf32, #tpu.memory_space<vmem>>, vector<2x32xf32>,
    %120 = vector.extract_strided_slice %0 {offsets = [12, 0], sizes = [2, 128], strides = [1, 1]} : vector<16x128xf32> to vector<2x128xf32>
    %cst_27 = arith.constant dense<0.000000e+00> : vector<2x128xf32>
    %121 = tpu.matmul %118, %5, %cst_27 {dimension_numbers = #tpu.dot_dimension_numbers<[1], [0], [0], [1], [0, 0, 1, 1], [], []>} : vector<2x32xf32>, vector<32x128xf32>, vector<2x128xf32> -> vector<2x128xf32>
    %122 = arith.addf %120, %121 : vector<2x128xf32>
    %123 = arith.negf %122 : vector<2x128xf32>
    %124 = math.exp %123 : vector<2x128xf32>
    %cst_28 = arith.constant 1.000000e+00 : f32
    %125 = vector.broadcast %cst_28 : f32 to vector<2x128xf32>
    %126 = arith.addf %125, %124 : vector<2x128xf32>
    %127 = arith.divf %125, %126 : vector<2x128xf32>
    %128 = vector.extract_strided_slice %127 {offsets = [0, 0], sizes = [2, 32], strides = [1, 1]} : vector<2x128xf32> to vector<2x32xf32>
    %129 = vector.extract_strided_slice %127 {offsets = [0, 32], sizes = [2, 32], strides = [1, 1]} : vector<2x128xf32> to vector<2x32xf32>
    %130 = vector.extract_strided_slice %127 {offsets = [0, 96], sizes = [2, 32], strides = [1, 1]} : vector<2x128xf32> to vector<2x32xf32>
    %131 = vector.extract_strided_slice %122 {offsets = [0, 64], sizes = [2, 32], strides = [1, 1]} : vector<2x128xf32> to vector<2x32xf32>
    %132 = math.tanh %131 : vector<2x32xf32>
    %133 = arith.mulf %129, %116 : vector<2x32xf32>
    %134 = arith.mulf %128, %132 : vector<2x32xf32>
    %135 = arith.addf %133, %134 : vector<2x32xf32>
    %136 = math.tanh %135 : vector<2x32xf32>
    %137 = arith.mulf %130, %136 : vector<2x32xf32>
    %c12 = arith.constant 12 : index
    %c0_29 = arith.constant 0 : index
    %138 = vector.load %arg10[%c12, %c0_29] : memref<16x32xf32, #tpu.memory_space<vmem>>, vector<2x32xf32>
    tpu.vector_store %arg10[%c12, %c0_29], %137 {strides = array<i32>} : memref<16x32xf32, #tpu.memory_space<vmem>>, vector<2x32xf32>,
    %139 = vector.extract_strided_slice %0 {offsets = [14, 0], sizes = [2, 128], strides = [1, 1]} : vector<16x128xf32> to vector<2x128xf32>
    %cst_30 = arith.constant dense<0.000000e+00> : vector<2x128xf32>
    %140 = tpu.matmul %137, %5, %cst_30 {dimension_numbers = #tpu.dot_dimension_numbers<[1], [0], [0], [1], [0, 0, 1, 1], [], []>} : vector<2x32xf32>, vector<32x128xf32>, vector<2x128xf32> -> vector<2x128xf32>
    %141 = arith.addf %139, %140 : vector<2x128xf32>
    %142 = arith.negf %141 : vector<2x128xf32>
    %143 = math.exp %142 : vector<2x128xf32>
    %cst_31 = arith.constant 1.000000e+00 : f32
    %144 = vector.broadcast %cst_31 : f32 to vector<2x128xf32>
    %145 = arith.addf %144, %143 : vector<2x128xf32>
    %146 = arith.divf %144, %145 : vector<2x128xf32>
    %147 = vector.extract_strided_slice %146 {offsets = [0, 0], sizes = [2, 32], strides = [1, 1]} : vector<2x128xf32> to vector<2x32xf32>
    %148 = vector.extract_strided_slice %146 {offsets = [0, 32], sizes = [2, 32], strides = [1, 1]} : vector<2x128xf32> to vector<2x32xf32>
    %149 = vector.extract_strided_slice %146 {offsets = [0, 96], sizes = [2, 32], strides = [1, 1]} : vector<2x128xf32> to vector<2x32xf32>
    %150 = vector.extract_strided_slice %141 {offsets = [0, 64], sizes = [2, 32], strides = [1, 1]} : vector<2x128xf32> to vector<2x32xf32>
    %151 = math.tanh %150 : vector<2x32xf32>
    %152 = arith.mulf %148, %135 : vector<2x32xf32>
    %153 = arith.mulf %147, %151 : vector<2x32xf32>
    %154 = arith.addf %152, %153 : vector<2x32xf32>
    %155 = math.tanh %154 : vector<2x32xf32>
    %156 = arith.mulf %149, %155 : vector<2x32xf32>
    %c14 = arith.constant 14 : index
    %c0_32 = arith.constant 0 : index
    %157 = vector.load %arg10[%c14, %c0_32] : memref<16x32xf32, #tpu.memory_space<vmem>>, vector<2x32xf32>
    tpu.vector_store %arg10[%c14, %c0_32], %156 {strides = array<i32>} : memref<16x32xf32, #tpu.memory_space<vmem>>, vector<2x32xf32>,
    %c0_33 = arith.constant 0 : index
    %c0_34 = arith.constant 0 : index
    %158 = vector.load %arg9[%c0_33, %c0_34] : memref<2x128xf32, #tpu.memory_space<vmem>>, vector<2x32xf32>
    tpu.vector_store %arg9[%c0_33, %c0_34], %156 {strides = array<i32>} : memref<2x128xf32, #tpu.memory_space<vmem>>, vector<2x32xf32>,
    %c0_35 = arith.constant 0 : index
    %c64 = arith.constant 64 : index
    %159 = vector.load %arg9[%c0_35, %c64] : memref<2x128xf32, #tpu.memory_space<vmem>>, vector<2x32xf32>
    tpu.vector_store %arg9[%c0_35, %c64], %154 {strides = array<i32>} : memref<2x128xf32, #tpu.memory_space<vmem>>, vector<2x32xf32>,
    %c0_36 = arith.constant 0 : index
    %c0_37 = arith.constant 0 : index
    %160 = vector.load %arg6[%c0_36, %c0_37] : memref<32x128xf32, #tpu.memory_space<vmem>>, vector<32x128xf32>
    %c0_38 = arith.constant 0 : index
    %c0_39 = arith.constant 0 : index
    %161 = vector.load %arg7[%c0_38, %c0_39] : memref<1x128xf32, #tpu.memory_space<vmem>>, vector<1x128xf32>
    %c0_40 = arith.constant 0 : index
    %c0_41 = arith.constant 0 : index
    %162 = vector.load %arg10[%c0_40, %c0_41] : memref<16x32xf32, #tpu.memory_space<vmem>>, vector<16x32xf32>
    %cst_42 = arith.constant dense<0.000000e+00> : vector<16x128xf32>
    %163 = tpu.matmul %162, %160, %cst_42 {dimension_numbers = #tpu.dot_dimension_numbers<[1], [0], [0], [1], [0, 0, 1, 1], [], []>} : vector<16x32xf32>, vector<32x128xf32>, vector<16x128xf32> -> vector<16x128xf32>
    %164 = vector.broadcast %161 : vector<1x128xf32> to vector<16x128xf32>
    %165 = arith.addf %163, %164 : vector<16x128xf32>
    %c1 = arith.constant 1 : index
    %c0_43 = arith.constant 0 : index
    %c0_44 = arith.constant 0 : index
    %166 = vector.load %arg2[%c1, %c0_43, %c0_44] : memref<2x2x32xf32, #tpu.memory_space<vmem>>, vector<1x2x32xf32>
    %167 = vector.shape_cast %166 : vector<1x2x32xf32> to vector<2x32xf32>
    %c1_45 = arith.constant 1 : index
    %c0_46 = arith.constant 0 : index
    %c0_47 = arith.constant 0 : index
    %168 = vector.load %arg3[%c1_45, %c0_46, %c0_47] : memref<2x2x32xf32, #tpu.memory_space<vmem>>, vector<1x2x32xf32>
    %169 = vector.shape_cast %168 : vector<1x2x32xf32> to vector<2x32xf32>
    %c0_48 = arith.constant 0 : index
    %c0_49 = arith.constant 0 : index
    %170 = vector.load %arg5[%c0_48, %c0_49] : memref<32x128xf32, #tpu.memory_space<vmem>>, vector<32x128xf32>
    %171 = vector.extract_strided_slice %165 {offsets = [0, 0], sizes = [2, 128], strides = [1, 1]} : vector<16x128xf32> to vector<2x128xf32>
    %cst_50 = arith.constant dense<0.000000e+00> : vector<2x128xf32>
    %172 = tpu.matmul %167, %170, %cst_50 {dimension_numbers = #tpu.dot_dimension_numbers<[1], [0], [0], [1], [0, 0, 1, 1], [], []>} : vector<2x32xf32>, vector<32x128xf32>, vector<2x128xf32> -> vector<2x128xf32>
    %173 = arith.addf %171, %172 : vector<2x128xf32>
    %174 = arith.negf %173 : vector<2x128xf32>
    %175 = math.exp %174 : vector<2x128xf32>
    %cst_51 = arith.constant 1.000000e+00 : f32
    %176 = vector.broadcast %cst_51 : f32 to vector<2x128xf32>
    %177 = arith.addf %176, %175 : vector<2x128xf32>
    %178 = arith.divf %176, %177 : vector<2x128xf32>
    %179 = vector.extract_strided_slice %178 {offsets = [0, 0], sizes = [2, 32], strides = [1, 1]} : vector<2x128xf32> to vector<2x32xf32>
    %180 = vector.extract_strided_slice %178 {offsets = [0, 32], sizes = [2, 32], strides = [1, 1]} : vector<2x128xf32> to vector<2x32xf32>
    %181 = vector.extract_strided_slice %178 {offsets = [0, 96], sizes = [2, 32], strides = [1, 1]} : vector<2x128xf32> to vector<2x32xf32>
    %182 = vector.extract_strided_slice %173 {offsets = [0, 64], sizes = [2, 32], strides = [1, 1]} : vector<2x128xf32> to vector<2x32xf32>
    %183 = math.tanh %182 : vector<2x32xf32>
    %184 = arith.mulf %180, %169 : vector<2x32xf32>
    %185 = arith.mulf %179, %183 : vector<2x32xf32>
    %186 = arith.addf %184, %185 : vector<2x32xf32>
    %187 = math.tanh %186 : vector<2x32xf32>
    %188 = arith.mulf %181, %187 : vector<2x32xf32>
    %c0_52 = arith.constant 0 : index
    %c0_53 = arith.constant 0 : index
    %189 = vector.load %arg8[%c0_52, %c0_53] : memref<2x256xf32, #tpu.memory_space<vmem>>, vector<2x32xf32>
    tpu.vector_store %arg8[%c0_52, %c0_53], %188 {strides = array<i32>} : memref<2x256xf32, #tpu.memory_space<vmem>>, vector<2x32xf32>,
    %190 = vector.extract_strided_slice %165 {offsets = [2, 0], sizes = [2, 128], strides = [1, 1]} : vector<16x128xf32> to vector<2x128xf32>
    %cst_54 = arith.constant dense<0.000000e+00> : vector<2x128xf32>
    %191 = tpu.matmul %188, %170, %cst_54 {dimension_numbers = #tpu.dot_dimension_numbers<[1], [0], [0], [1], [0, 0, 1, 1], [], []>} : vector<2x32xf32>, vector<32x128xf32>, vector<2x128xf32> -> vector<2x128xf32>
    %192 = arith.addf %190, %191 : vector<2x128xf32>
    %193 = arith.negf %192 : vector<2x128xf32>
    %194 = math.exp %193 : vector<2x128xf32>
    %cst_55 = arith.constant 1.000000e+00 : f32
    %195 = vector.broadcast %cst_55 : f32 to vector<2x128xf32>
    %196 = arith.addf %195, %194 : vector<2x128xf32>
    %197 = arith.divf %195, %196 : vector<2x128xf32>
    %198 = vector.extract_strided_slice %197 {offsets = [0, 0], sizes = [2, 32], strides = [1, 1]} : vector<2x128xf32> to vector<2x32xf32>
    %199 = vector.extract_strided_slice %197 {offsets = [0, 32], sizes = [2, 32], strides = [1, 1]} : vector<2x128xf32> to vector<2x32xf32>
    %200 = vector.extract_strided_slice %197 {offsets = [0, 96], sizes = [2, 32], strides = [1, 1]} : vector<2x128xf32> to vector<2x32xf32>
    %201 = vector.extract_strided_slice %192 {offsets = [0, 64], sizes = [2, 32], strides = [1, 1]} : vector<2x128xf32> to vector<2x32xf32>
    %202 = math.tanh %201 : vector<2x32xf32>
    %203 = arith.mulf %199, %186 : vector<2x32xf32>
    %204 = arith.mulf %198, %202 : vector<2x32xf32>
    %205 = arith.addf %203, %204 : vector<2x32xf32>
    %206 = math.tanh %205 : vector<2x32xf32>
    %207 = arith.mulf %200, %206 : vector<2x32xf32>
    %c0_56 = arith.constant 0 : index
    %c32 = arith.constant 32 : index
    %208 = vector.load %arg8[%c0_56, %c32] : memref<2x256xf32, #tpu.memory_space<vmem>>, vector<2x32xf32>
    tpu.vector_store %arg8[%c0_56, %c32], %207 {strides = array<i32>} : memref<2x256xf32, #tpu.memory_space<vmem>>, vector<2x32xf32>,
    %209 = vector.extract_strided_slice %165 {offsets = [4, 0], sizes = [2, 128], strides = [1, 1]} : vector<16x128xf32> to vector<2x128xf32>
    %cst_57 = arith.constant dense<0.000000e+00> : vector<2x128xf32>
    %210 = tpu.matmul %207, %170, %cst_57 {dimension_numbers = #tpu.dot_dimension_numbers<[1], [0], [0], [1], [0, 0, 1, 1], [], []>} : vector<2x32xf32>, vector<32x128xf32>, vector<2x128xf32> -> vector<2x128xf32>
    %211 = arith.addf %209, %210 : vector<2x128xf32>
    %212 = arith.negf %211 : vector<2x128xf32>
    %213 = math.exp %212 : vector<2x128xf32>
    %cst_58 = arith.constant 1.000000e+00 : f32
    %214 = vector.broadcast %cst_58 : f32 to vector<2x128xf32>
    %215 = arith.addf %214, %213 : vector<2x128xf32>
    %216 = arith.divf %214, %215 : vector<2x128xf32>
    %217 = vector.extract_strided_slice %216 {offsets = [0, 0], sizes = [2, 32], strides = [1, 1]} : vector<2x128xf32> to vector<2x32xf32>
    %218 = vector.extract_strided_slice %216 {offsets = [0, 32], sizes = [2, 32], strides = [1, 1]} : vector<2x128xf32> to vector<2x32xf32>
    %219 = vector.extract_strided_slice %216 {offsets = [0, 96], sizes = [2, 32], strides = [1, 1]} : vector<2x128xf32> to vector<2x32xf32>
    %220 = vector.extract_strided_slice %211 {offsets = [0, 64], sizes = [2, 32], strides = [1, 1]} : vector<2x128xf32> to vector<2x32xf32>
    %221 = math.tanh %220 : vector<2x32xf32>
    %222 = arith.mulf %218, %205 : vector<2x32xf32>
    %223 = arith.mulf %217, %221 : vector<2x32xf32>
    %224 = arith.addf %222, %223 : vector<2x32xf32>
    %225 = math.tanh %224 : vector<2x32xf32>
    %226 = arith.mulf %219, %225 : vector<2x32xf32>
    %c0_59 = arith.constant 0 : index
    %c64_60 = arith.constant 64 : index
    %227 = vector.load %arg8[%c0_59, %c64_60] : memref<2x256xf32, #tpu.memory_space<vmem>>, vector<2x32xf32>
    tpu.vector_store %arg8[%c0_59, %c64_60], %226 {strides = array<i32>} : memref<2x256xf32, #tpu.memory_space<vmem>>, vector<2x32xf32>,
    %228 = vector.extract_strided_slice %165 {offsets = [6, 0], sizes = [2, 128], strides = [1, 1]} : vector<16x128xf32> to vector<2x128xf32>
    %cst_61 = arith.constant dense<0.000000e+00> : vector<2x128xf32>
    %229 = tpu.matmul %226, %170, %cst_61 {dimension_numbers = #tpu.dot_dimension_numbers<[1], [0], [0], [1], [0, 0, 1, 1], [], []>} : vector<2x32xf32>, vector<32x128xf32>, vector<2x128xf32> -> vector<2x128xf32>
    %230 = arith.addf %228, %229 : vector<2x128xf32>
    %231 = arith.negf %230 : vector<2x128xf32>
    %232 = math.exp %231 : vector<2x128xf32>
    %cst_62 = arith.constant 1.000000e+00 : f32
    %233 = vector.broadcast %cst_62 : f32 to vector<2x128xf32>
    %234 = arith.addf %233, %232 : vector<2x128xf32>
    %235 = arith.divf %233, %234 : vector<2x128xf32>
    %236 = vector.extract_strided_slice %235 {offsets = [0, 0], sizes = [2, 32], strides = [1, 1]} : vector<2x128xf32> to vector<2x32xf32>
    %237 = vector.extract_strided_slice %235 {offsets = [0, 32], sizes = [2, 32], strides = [1, 1]} : vector<2x128xf32> to vector<2x32xf32>
    %238 = vector.extract_strided_slice %235 {offsets = [0, 96], sizes = [2, 32], strides = [1, 1]} : vector<2x128xf32> to vector<2x32xf32>
    %239 = vector.extract_strided_slice %230 {offsets = [0, 64], sizes = [2, 32], strides = [1, 1]} : vector<2x128xf32> to vector<2x32xf32>
    %240 = math.tanh %239 : vector<2x32xf32>
    %241 = arith.mulf %237, %224 : vector<2x32xf32>
    %242 = arith.mulf %236, %240 : vector<2x32xf32>
    %243 = arith.addf %241, %242 : vector<2x32xf32>
    %244 = math.tanh %243 : vector<2x32xf32>
    %245 = arith.mulf %238, %244 : vector<2x32xf32>
    %c0_63 = arith.constant 0 : index
    %c96 = arith.constant 96 : index
    %246 = vector.load %arg8[%c0_63, %c96] : memref<2x256xf32, #tpu.memory_space<vmem>>, vector<2x32xf32>
    tpu.vector_store %arg8[%c0_63, %c96], %245 {strides = array<i32>} : memref<2x256xf32, #tpu.memory_space<vmem>>, vector<2x32xf32>,
    %247 = vector.extract_strided_slice %165 {offsets = [8, 0], sizes = [2, 128], strides = [1, 1]} : vector<16x128xf32> to vector<2x128xf32>
    %cst_64 = arith.constant dense<0.000000e+00> : vector<2x128xf32>
    %248 = tpu.matmul %245, %170, %cst_64 {dimension_numbers = #tpu.dot_dimension_numbers<[1], [0], [0], [1], [0, 0, 1, 1], [], []>} : vector<2x32xf32>, vector<32x128xf32>, vector<2x128xf32> -> vector<2x128xf32>
    %249 = arith.addf %247, %248 : vector<2x128xf32>
    %250 = arith.negf %249 : vector<2x128xf32>
    %251 = math.exp %250 : vector<2x128xf32>
    %cst_65 = arith.constant 1.000000e+00 : f32
    %252 = vector.broadcast %cst_65 : f32 to vector<2x128xf32>
    %253 = arith.addf %252, %251 : vector<2x128xf32>
    %254 = arith.divf %252, %253 : vector<2x128xf32>
    %255 = vector.extract_strided_slice %254 {offsets = [0, 0], sizes = [2, 32], strides = [1, 1]} : vector<2x128xf32> to vector<2x32xf32>
    %256 = vector.extract_strided_slice %254 {offsets = [0, 32], sizes = [2, 32], strides = [1, 1]} : vector<2x128xf32> to vector<2x32xf32>
    %257 = vector.extract_strided_slice %254 {offsets = [0, 96], sizes = [2, 32], strides = [1, 1]} : vector<2x128xf32> to vector<2x32xf32>
    %258 = vector.extract_strided_slice %249 {offsets = [0, 64], sizes = [2, 32], strides = [1, 1]} : vector<2x128xf32> to vector<2x32xf32>
    %259 = math.tanh %258 : vector<2x32xf32>
    %260 = arith.mulf %256, %243 : vector<2x32xf32>
    %261 = arith.mulf %255, %259 : vector<2x32xf32>
    %262 = arith.addf %260, %261 : vector<2x32xf32>
    %263 = math.tanh %262 : vector<2x32xf32>
    %264 = arith.mulf %257, %263 : vector<2x32xf32>
    %c0_66 = arith.constant 0 : index
    %c128 = arith.constant 128 : index
    %265 = vector.load %arg8[%c0_66, %c128] : memref<2x256xf32, #tpu.memory_space<vmem>>, vector<2x32xf32>
    tpu.vector_store %arg8[%c0_66, %c128], %264 {strides = array<i32>} : memref<2x256xf32, #tpu.memory_space<vmem>>, vector<2x32xf32>,
    %266 = vector.extract_strided_slice %165 {offsets = [10, 0], sizes = [2, 128], strides = [1, 1]} : vector<16x128xf32> to vector<2x128xf32>
    %cst_67 = arith.constant dense<0.000000e+00> : vector<2x128xf32>
    %267 = tpu.matmul %264, %170, %cst_67 {dimension_numbers = #tpu.dot_dimension_numbers<[1], [0], [0], [1], [0, 0, 1, 1], [], []>} : vector<2x32xf32>, vector<32x128xf32>, vector<2x128xf32> -> vector<2x128xf32>
    %268 = arith.addf %266, %267 : vector<2x128xf32>
    %269 = arith.negf %268 : vector<2x128xf32>
    %270 = math.exp %269 : vector<2x128xf32>
    %cst_68 = arith.constant 1.000000e+00 : f32
    %271 = vector.broadcast %cst_68 : f32 to vector<2x128xf32>
    %272 = arith.addf %271, %270 : vector<2x128xf32>
    %273 = arith.divf %271, %272 : vector<2x128xf32>
    %274 = vector.extract_strided_slice %273 {offsets = [0, 0], sizes = [2, 32], strides = [1, 1]} : vector<2x128xf32> to vector<2x32xf32>
    %275 = vector.extract_strided_slice %273 {offsets = [0, 32], sizes = [2, 32], strides = [1, 1]} : vector<2x128xf32> to vector<2x32xf32>
    %276 = vector.extract_strided_slice %273 {offsets = [0, 96], sizes = [2, 32], strides = [1, 1]} : vector<2x128xf32> to vector<2x32xf32>
    %277 = vector.extract_strided_slice %268 {offsets = [0, 64], sizes = [2, 32], strides = [1, 1]} : vector<2x128xf32> to vector<2x32xf32>
    %278 = math.tanh %277 : vector<2x32xf32>
    %279 = arith.mulf %275, %262 : vector<2x32xf32>
    %280 = arith.mulf %274, %278 : vector<2x32xf32>
    %281 = arith.addf %279, %280 : vector<2x32xf32>
    %282 = math.tanh %281 : vector<2x32xf32>
    %283 = arith.mulf %276, %282 : vector<2x32xf32>
    %c0_69 = arith.constant 0 : index
    %c160 = arith.constant 160 : index
    %284 = vector.load %arg8[%c0_69, %c160] : memref<2x256xf32, #tpu.memory_space<vmem>>, vector<2x32xf32>
    tpu.vector_store %arg8[%c0_69, %c160], %283 {strides = array<i32>} : memref<2x256xf32, #tpu.memory_space<vmem>>, vector<2x32xf32>,
    %285 = vector.extract_strided_slice %165 {offsets = [12, 0], sizes = [2, 128], strides = [1, 1]} : vector<16x128xf32> to vector<2x128xf32>
    %cst_70 = arith.constant dense<0.000000e+00> : vector<2x128xf32>
    %286 = tpu.matmul %283, %170, %cst_70 {dimension_numbers = #tpu.dot_dimension_numbers<[1], [0], [0], [1], [0, 0, 1, 1], [], []>} : vector<2x32xf32>, vector<32x128xf32>, vector<2x128xf32> -> vector<2x128xf32>
    %287 = arith.addf %285, %286 : vector<2x128xf32>
    %288 = arith.negf %287 : vector<2x128xf32>
    %289 = math.exp %288 : vector<2x128xf32>
    %cst_71 = arith.constant 1.000000e+00 : f32
    %290 = vector.broadcast %cst_71 : f32 to vector<2x128xf32>
    %291 = arith.addf %290, %289 : vector<2x128xf32>
    %292 = arith.divf %290, %291 : vector<2x128xf32>
    %293 = vector.extract_strided_slice %292 {offsets = [0, 0], sizes = [2, 32], strides = [1, 1]} : vector<2x128xf32> to vector<2x32xf32>
    %294 = vector.extract_strided_slice %292 {offsets = [0, 32], sizes = [2, 32], strides = [1, 1]} : vector<2x128xf32> to vector<2x32xf32>
    %295 = vector.extract_strided_slice %292 {offsets = [0, 96], sizes = [2, 32], strides = [1, 1]} : vector<2x128xf32> to vector<2x32xf32>
    %296 = vector.extract_strided_slice %287 {offsets = [0, 64], sizes = [2, 32], strides = [1, 1]} : vector<2x128xf32> to vector<2x32xf32>
    %297 = math.tanh %296 : vector<2x32xf32>
    %298 = arith.mulf %294, %281 : vector<2x32xf32>
    %299 = arith.mulf %293, %297 : vector<2x32xf32>
    %300 = arith.addf %298, %299 : vector<2x32xf32>
    %301 = math.tanh %300 : vector<2x32xf32>
    %302 = arith.mulf %295, %301 : vector<2x32xf32>
    %c0_72 = arith.constant 0 : index
    %c192 = arith.constant 192 : index
    %303 = vector.load %arg8[%c0_72, %c192] : memref<2x256xf32, #tpu.memory_space<vmem>>, vector<2x32xf32>
    tpu.vector_store %arg8[%c0_72, %c192], %302 {strides = array<i32>} : memref<2x256xf32, #tpu.memory_space<vmem>>, vector<2x32xf32>,
    %304 = vector.extract_strided_slice %165 {offsets = [14, 0], sizes = [2, 128], strides = [1, 1]} : vector<16x128xf32> to vector<2x128xf32>
    %cst_73 = arith.constant dense<0.000000e+00> : vector<2x128xf32>
    %305 = tpu.matmul %302, %170, %cst_73 {dimension_numbers = #tpu.dot_dimension_numbers<[1], [0], [0], [1], [0, 0, 1, 1], [], []>} : vector<2x32xf32>, vector<32x128xf32>, vector<2x128xf32> -> vector<2x128xf32>
    %306 = arith.addf %304, %305 : vector<2x128xf32>
    %307 = arith.negf %306 : vector<2x128xf32>
    %308 = math.exp %307 : vector<2x128xf32>
    %cst_74 = arith.constant 1.000000e+00 : f32
    %309 = vector.broadcast %cst_74 : f32 to vector<2x128xf32>
    %310 = arith.addf %309, %308 : vector<2x128xf32>
    %311 = arith.divf %309, %310 : vector<2x128xf32>
    %312 = vector.extract_strided_slice %311 {offsets = [0, 0], sizes = [2, 32], strides = [1, 1]} : vector<2x128xf32> to vector<2x32xf32>
    %313 = vector.extract_strided_slice %311 {offsets = [0, 32], sizes = [2, 32], strides = [1, 1]} : vector<2x128xf32> to vector<2x32xf32>
    %314 = vector.extract_strided_slice %311 {offsets = [0, 96], sizes = [2, 32], strides = [1, 1]} : vector<2x128xf32> to vector<2x32xf32>
    %315 = vector.extract_strided_slice %306 {offsets = [0, 64], sizes = [2, 32], strides = [1, 1]} : vector<2x128xf32> to vector<2x32xf32>
    %316 = math.tanh %315 : vector<2x32xf32>
    %317 = arith.mulf %313, %300 : vector<2x32xf32>
    %318 = arith.mulf %312, %316 : vector<2x32xf32>
    %319 = arith.addf %317, %318 : vector<2x32xf32>
    %320 = math.tanh %319 : vector<2x32xf32>
    %321 = arith.mulf %314, %320 : vector<2x32xf32>
    %c0_75 = arith.constant 0 : index
    %c224 = arith.constant 224 : index
    %322 = vector.load %arg8[%c0_75, %c224] : memref<2x256xf32, #tpu.memory_space<vmem>>, vector<2x32xf32>
    tpu.vector_store %arg8[%c0_75, %c224], %321 {strides = array<i32>} : memref<2x256xf32, #tpu.memory_space<vmem>>, vector<2x32xf32>,
    %c0_76 = arith.constant 0 : index
    %c32_77 = arith.constant 32 : index
    %323 = vector.load %arg9[%c0_76, %c32_77] : memref<2x128xf32, #tpu.memory_space<vmem>>, vector<2x32xf32>
    tpu.vector_store %arg9[%c0_76, %c32_77], %321 {strides = array<i32>} : memref<2x128xf32, #tpu.memory_space<vmem>>, vector<2x32xf32>,
    %c0_78 = arith.constant 0 : index
    %c96_79 = arith.constant 96 : index
    %324 = vector.load %arg9[%c0_78, %c96_79] : memref<2x128xf32, #tpu.memory_space<vmem>>, vector<2x32xf32>
    tpu.vector_store %arg9[%c0_78, %c96_79], %319 {strides = array<i32>} : memref<2x128xf32, #tpu.memory_space<vmem>>, vector<2x32xf32>,
    return
  }
  func.func @transform_0(%arg0: i32) -> (i32, i32) {
    %c0_i32 = arith.constant 0 : i32
    %c0_i32_0 = arith.constant 0 : i32
    %c0_i32_1 = arith.constant 0 : i32
    return %c0_i32, %c0_i32_0 : i32, i32
  }
  func.func @transform_1(%arg0: i32) -> (i32, i32, i32) {
    %c0_i32 = arith.constant 0 : i32
    %c0_i32_0 = arith.constant 0 : i32
    %c0_i32_1 = arith.constant 0 : i32
    %c0_i32_2 = arith.constant 0 : i32
    return %c0_i32, %c0_i32_0, %c0_i32_1 : i32, i32, i32
  }
  func.func @transform_2(%arg0: i32) -> (i32, i32, i32) {
    %c0_i32 = arith.constant 0 : i32
    %c0_i32_0 = arith.constant 0 : i32
    %c0_i32_1 = arith.constant 0 : i32
    %c0_i32_2 = arith.constant 0 : i32
    return %c0_i32, %c0_i32_0, %c0_i32_1 : i32, i32, i32
  }
  func.func @transform_3(%arg0: i32) -> (i32, i32) {
    %c0_i32 = arith.constant 0 : i32
    %c0_i32_0 = arith.constant 0 : i32
    %c0_i32_1 = arith.constant 0 : i32
    return %c0_i32, %c0_i32_0 : i32, i32
  }
  func.func @transform_4(%arg0: i32) -> (i32, i32) {
    %c0_i32 = arith.constant 0 : i32
    %c0_i32_0 = arith.constant 0 : i32
    %c0_i32_1 = arith.constant 0 : i32
    return %c0_i32, %c0_i32_0 : i32, i32
  }
  func.func @transform_5(%arg0: i32) -> (i32, i32) {
    %c0_i32 = arith.constant 0 : i32
    %c0_i32_0 = arith.constant 0 : i32
    %c0_i32_1 = arith.constant 0 : i32
    return %c0_i32, %c0_i32_0 : i32, i32
  }
  func.func @transform_6(%arg0: i32) -> (i32, i32) {
    %c0_i32 = arith.constant 0 : i32
    %c0_i32_0 = arith.constant 0 : i32
    %c0_i32_1 = arith.constant 0 : i32
    return %c0_i32, %c0_i32_0 : i32, i32
  }
  func.func @transform_7(%arg0: i32) -> (i32, i32) {
    %c0_i32 = arith.constant 0 : i32
    %c0_i32_0 = arith.constant 0 : i32
    %c0_i32_1 = arith.constant 0 : i32
    return %c0_i32, %c0_i32_0 : i32, i32
  }
  func.func @transform_8(%arg0: i32) -> (i32, i32) {
    %c0_i32 = arith.constant 0 : i32
    %c0_i32_0 = arith.constant 0 : i32
    %c0_i32_1 = arith.constant 0 : i32
    return %c0_i32, %c0_i32_0 : i32, i32
  }
}

</mosaic_0001>

<bundles_post_ra>
// kernel: tpu_custom_call.1
= control target key start
LH: loop header
LB: loop body
LE: loop exit
PB: predicated region body
PF: predicated region fallthrough
CT: control target
= control target key end

     0   :  { %14 = vsyncpa [#allocation4], 0  ;;  %s3248_s0 = inlined_call_operand.hbm [shape: f32[16,128], index: 0, kind: input, shape index: {}]   ;;  %s3249_s1 = inlined_call_operand.hbm [shape: f32[2,2,32], index: 1, kind: input, shape index: {}]   ;;  %s3250_s2 = inlined_call_operand.vmem [shape: f32[2,2,32], index: 2, kind: input, shape index: {}]   ;;  %s3251_s3 = inlined_call_operand.hbm [shape: f32[32,128], index: 3, kind: input, shape index: {}]   ;;  %s3252_s4 = inlined_call_operand.hbm [shape: f32[32,128], index: 4, kind: input, shape index: {}]   ;;  %s3253_s5 = inlined_call_operand.hbm [shape: f32[32,128], index: 5, kind: input, shape index: {}]   ;;  %s3254_s6 = inlined_call_operand.vmem [shape: f32[1,128], index: 6, kind: input, shape index: {}]   ;;  %s3255_s7 = inlined_call_operand.hbm [shape: f32[2,256], index: 7, kind: output, shape index: {0}]   ;;  %s3256_s8 = inlined_call_operand.hbm [shape: f32[2,128], index: 8, kind: output, shape index: {1}]  }
   0x1   :  { %15 = vsyncpa [#allocation7], 0 }
   0x2   :  { %16 = vsyncpa [#allocation10], 0 }
   0x3   :  { %17 = vsyncpa [#allocation5], 0 }
   0x4   :  { %18 = vsyncpa [#allocation14], 0  ;;  %s2801_s27 = smov [#allocation6]   ;;  %s2637_s9 = scalar_lea.hbm %s3249_s1, 64 }
   0x5   :  { %s36_s28 = sshll.u32 %s2801_s27, 4  ;;  %p2638_p0 = scmp.ne.s32.totalorder %s3249_s1, %s2637_s9  ;;  %s37_s28 = int_to_ptr.vmem [resolvable:$true] %s36_s28 }
   0x6   :  { %p2641_p1 = scmp.lt.u32.totalorder %s2637_s9, %s3249_s1 }
   0x8   :  { %p2643_p2 = pnand %p2641_p1, %p2638_p0 }
   0xa   :  { %2646 = shalt.err (!%p2643_p2)
}
   0xb   :  { %s2647_s14 = scalar_lea.vmem %s37_s28, 64  ;;  %p2652_p4 = scmp.lt.s32.totalorder %s37_s28, %s37_s28 }
   0xc   :  { %p2648_p3 = scmp.ne.s32.totalorder %s37_s28, %s2647_s14  ;;  %p2653_p5 = scmp.lt.s32.totalorder %s2647_s14, %s2647_s14 }
   0xe   :  { %p2654_p6 = por %p2653_p5, %p2652_p4 }
  0x10   :  { %p2655_p7 = pnand %p2654_p6, %p2648_p3 }
  0x12   :  { %2658 = shalt.err (!%p2655_p7)
}
  0x13   :  { %s2802_s15 = smov 32   ;;  %s2803_s16 = smov 2  }
  0x14   :  { %42 = dma.hbm_to_vmem [thread:$0]  %s3249_s1, 64, %s37_s28, [#allocation7], %s2802_s15, %s2802_s15, %s2803_s16  }
  0x15   :  { %s2804_s19 = smov [#allocation9]   ;;  %s2805_s21 = smov [#allocation3]  }
  0x16   :  { %s62_s20 = sshll.u32 %s2804_s19, 4  ;;  %s24_s22 = sshll.u32 %s2805_s21, 4  ;;  %s63_s20 = int_to_ptr.vmem [resolvable:$true] %s62_s20  ;;  %s25_s22 = int_to_ptr.vmem [resolvable:$true] %s24_s22 }
  0x17   :  { %s2659_s25 = scalar_lea.hbm %s3252_s4, 512 }
  0x18   :  { %p2660_p8 = scmp.ne.s32.totalorder %s3252_s4, %s2659_s25  ;;  %p2663_p9 = scmp.lt.u32.totalorder %s2659_s25, %s3252_s4 }
  0x1a   :  { %p2665_p10 = pnand %p2663_p9, %p2660_p8 }
  0x1c   :  { %2668 = shalt.err (!%p2665_p10)
}
  0x1d   :  { %s2669_s1 = scalar_lea.vmem %s63_s20, 512  ;;  %p2674_p12 = scmp.lt.s32.totalorder %s63_s20, %s63_s20 }
  0x1e   :  { %p2670_p11 = scmp.ne.s32.totalorder %s63_s20, %s2669_s1  ;;  %p2675_p13 = scmp.lt.s32.totalorder %s2669_s1, %s2669_s1 }
  0x20   :  { %p2676_p0 = por %p2675_p13, %p2674_p12 }
  0x22   :  { %p2677_p1 = pnand %p2676_p0, %p2670_p11 }
  0x24   :  { %2680 = shalt.err (!%p2677_p1)
}
  0x25   :  { %s2806_s28 = smov 128   ;;  %s2807_s9 = smov 8  }
  0x26   :  { %68 = dma.hbm_to_vmem [thread:$0]  %s3252_s4, 512, %s63_s20, [#allocation10], %s2806_s28, %s2806_s28, %s2807_s9  }
  0x27   :  { %s2681_s14 = scalar_lea.hbm %s3248_s0, 256 }
  0x28   :  { %p2682_p2 = scmp.ne.s32.totalorder %s3248_s0, %s2681_s14  ;;  %p2685_p3 = scmp.lt.u32.totalorder %s2681_s14, %s3248_s0 }
  0x2a   :  { %p2687_p4 = pnand %p2685_p3, %p2682_p2 }
  0x2c   :  { %2690 = shalt.err (!%p2687_p4)
}
  0x2d   :  { %s2691_s21 = scalar_lea.vmem %s25_s22, 256  ;;  %p2696_p6 = scmp.lt.s32.totalorder %s25_s22, %s25_s22 }
  0x2e   :  { %p2692_p5 = scmp.ne.s32.totalorder %s25_s22, %s2691_s21  ;;  %p2697_p7 = scmp.lt.s32.totalorder %s2691_s21, %s2691_s21 }
  0x30   :  { %p2698_p8 = por %p2697_p7, %p2696_p6 }
  0x32   :  { %p2699_p9 = pnand %p2698_p8, %p2692_p5 }
  0x34   :  { %2702 = shalt.err (!%p2699_p9)
}
  0x35   :  { %30 = dma.hbm_to_vmem [thread:$0]  %s3248_s0, 256, %s25_s22, [#allocation4], %s2806_s28, %s2806_s28, %s2807_s9  }
  0x36   :  { %s2808_s23 = smov [#allocation8]   ;;  %s2809_s25 = smov [#allocation11]  }
  0x37   :  { %s50_s24 = sshll.u32 %s2808_s23, 4  ;;  %s74_s26 = sshll.u32 %s2809_s25, 4  ;;  %s51_s24 = int_to_ptr.vmem [resolvable:$true] %s50_s24  ;;  %s75_s26 = int_to_ptr.vmem [resolvable:$true] %s74_s26 }
  0x38   :  { %s2703_s30 = scalar_lea.hbm %s3251_s3, 512 }
  0x39   :  { %p2704_p10 = scmp.ne.s32.totalorder %s3251_s3, %s2703_s30  ;;  %p2707_p11 = scmp.lt.u32.totalorder %s2703_s30, %s3251_s3 }
  0x3b   :  { %p2709_p12 = pnand %p2707_p11, %p2704_p10 }
  0x3d   :  { %2712 = shalt.err (!%p2709_p12)
}
  0x3e   :  { %s2713_s0 = scalar_lea.vmem %s51_s24, 512  ;;  %p2718_p0 = scmp.lt.s32.totalorder %s51_s24, %s51_s24 }
  0x3f   :  { %p2714_p13 = scmp.ne.s32.totalorder %s51_s24, %s2713_s0  ;;  %p2719_p1 = scmp.lt.s32.totalorder %s2713_s0, %s2713_s0 }
  0x41   :  { %p2720_p2 = por %p2719_p1, %p2718_p0 }
  0x43   :  { %p2721_p3 = pnand %p2720_p2, %p2714_p13 }
  0x45   :  { %2724 = shalt.err (!%p2721_p3)
}
  0x46   :  { %56 = dma.hbm_to_vmem [thread:$0]  %s3251_s3, 512, %s51_s24, [#allocation7], %s2806_s28, %s2806_s28, %s2807_s9  }
  0x47   :  { %s2725_s17 = scalar_lea.hbm %s3253_s5, 512 }
  0x48   :  { %p2726_p4 = scmp.ne.s32.totalorder %s3253_s5, %s2725_s17  ;;  %p2729_p5 = scmp.lt.u32.totalorder %s2725_s17, %s3253_s5 }
  0x4a   :  { %p2731_p6 = pnand %p2729_p5, %p2726_p4 }
  0x4c   :  { %2734 = shalt.err (!%p2731_p6)
}
  0x4d   :  { %s2735_s20 = scalar_lea.vmem %s75_s26, 512  ;;  %p2740_p8 = scmp.lt.s32.totalorder %s75_s26, %s75_s26 }
  0x4e   :  { %p2736_p7 = scmp.ne.s32.totalorder %s75_s26, %s2735_s20  ;;  %p2741_p9 = scmp.lt.s32.totalorder %s2735_s20, %s2735_s20 }
  0x50   :  { %p2742_p10 = por %p2741_p9, %p2740_p8 }
  0x52   :  { %p2743_p11 = pnand %p2742_p10, %p2736_p7 }
  0x54   :  { %2746 = shalt.err (!%p2743_p11)
}
  0x55   :  { %80 = dma.hbm_to_vmem [thread:$0]  %s3253_s5, 512, %s75_s26, [#allocation10], %s2806_s28, %s2806_s28, %s2807_s9  }
  0x56   :  { %2791 = dma.done.wait [#allocation4], 256  }
  0x57   :  { %2792 = vsyncadd [#allocation4], 4294967040 }
  0x58   :  { %2793 = dma.done.wait [#allocation7], 576  }
  0x59   :  { %2794 = vsyncadd [#allocation7], 4294966720 }
  0x5a   :  { %2795 = dma.done.wait [#allocation10], 1024  }
  0x5b   :  { %2796 = vsyncadd [#allocation10], 4294966272  ;;  %v2810_v0 = vmov 0.0|0.0   ;;  %vm2811_vm0 = vmmov 0   ;;  %v2812_v1 = vmov 0.0   ;;  %v102_v2 = vld [vmem:[#allocation8] sm:$0xff] }
  0x5c   :  { %2388 = vmatprep.subr.bf16.mxu0 %v2810_v0  ;;  %2209 = vmatprep.mubr.msk.f32.mxu0 %vm2811_vm0, %v2812_v1  ;;  %v103_v3 = vld [vmem:[#allocation8 + $0x8] sm:$0xff]  ;;  %v104_v4 = vld [vmem:[#allocation8 + $0x10] sm:$0xff]  ;;  %v105_v6 = vld [vmem:[#allocation8 + $0x18] sm:$0xff]  ;;  %vm106_vm1 = vcmask 261120   ;;  %s2813_s5 = smov 64   ;;  %vm213_vm2 = vcmask 254976  }
  0x5d   :  { %2394 = vmatprep.subr.bf16.mxu1 %v2810_v0  ;;  %2220 = vmatprep.mubr.msk.f32.mxu1 %vm2811_vm0, %v2812_v1  ;;  %v2943_v5 = vpack.c.bf16 %v103_v3, %v102_v2  ;;  %v2946_v7 = vpack.c.bf16 %v105_v6, %v104_v4  ;;  %v100_v8 = vld [vmem:[#allocation6] sm:$0x3]  ;;  %v2962_v9 = vld [vmem:[#allocation3] sm:$0xff]  ;;  %vm322_vm3 = vcmask 257026   ;;  %vm546_vm4 = vcmask 261126  }
  0x5e   :  { %v101_v14 = vld [vmem:[%s3250_s2] sm:$0x3]  ;;  %vm434_vm5 = vcmask 259076   ;;  %vm991_vm6 = vcmask 785926   ;;  %vm1326_vm7 = vcmask 517376   ;;  %vm1446_vm8 = vcmask 779776  }
  0x5f   :  { %2390 = vmatpush3.bf16.msra.mxu0 %v2943_v5  ;;  %2396 = vmatpush3.bf16.msra.mxu1 %v2943_v5  ;;  %vm1565_vm9 = vcmask 1042176  }
  0x60   :  { %2391 = vmatprep.subr.bf16.mxu0 %v2810_v0  ;;  %2397 = vmatprep.subr.bf16.mxu1 %v2810_v0 }
  0x63   :  { %2393 = vmatpush3.bf16.msra.mxu0 %v2946_v7  ;;  %2399 = vmatpush3.bf16.msra.mxu1 %v2946_v7 }
  0x64   :  { %2400 = vmatprep.subr.bf16.mxu0 %v2810_v0  ;;  %2406 = vmatprep.subr.bf16.mxu1 %v2810_v0 }
  0x66   :  { %2210 = vmatmul.mubr.msk.f32.vlgmr.msra.gmra.mrb[0].mxu0 %vm106_vm1, %v100_v8 }
  0x67   :  { %2402 = vmatpush3.bf16.msra.mxu0 %v2943_v5  ;;  %2231 = vmatprep.mubr.msk.f32.mxu0 %vm2811_vm0, %v2812_v1 }
  0x68   :  { %2403 = vmatprep.subr.bf16.mxu0 %v2810_v0 }
  0x6b   :  { %2405 = vmatpush3.bf16.msra.mxu0 %v2946_v7 }
  0x6c   :  { %2412 = vmatprep.subr.bf16.mxu0 %v2810_v0 }
 0x139   :  { %v176_v10 = vpop.f32.mrb[0].mxu0 }
 0x13a   :  { %v180_v11 = vadd.f32 %v176_v10, %v2962_v9  ;;  %v2211_v12 = vpop.f32.mrb[1].mxu0 }
 0x13c   :  { %2509 = vtanh.f32 %v180_v11  ;;  %v2080_v15 = vmul.f32 -1.442695, %v180_v11 }
 0x13e   :  { %2511 = vpow2.f32 %v2080_v15 }
 0x146   :  { %v2510_v13 = vpop.eup %2509 }
 0x147   :  { %194 = vrot.lane.b32.xlu0 %v2510_v13, %s2813_s5 }
 0x148   :  { %v2512_v16 = vpop.eup %2511 }
 0x149   :  { %v184_v17 = vadd.f32 1.0, %v2512_v16 }
 0x14b   :  { %189 = vrot.lane.b32.xlu0 %v101_v14, %s2802_s15  ;;  %2513 = vrcp.f32 %v184_v17 }
 0x155   :  { %v2514_v18 = vpop.eup %2513 }
 0x1b9   :  { %v195_v19 = vpop.permute.xlu0 %194 }
 0x1ba   :  { %v197_v20 = vmul.f32 %v2514_v18, %v195_v19 }
 0x1bc   :  { %199 = vrot.lane.b32.xlu1 %v197_v20, %s2802_s15 }
 0x1bd   :  { %v190_v21 = vpop.permute.xlu0 %189 }
 0x1be   :  { %v192_v22 = vmul.f32 %v2514_v18, %v190_v21 }
 0x22e   :  { %v200_v23 = vpop.permute.xlu1 %199 }
 0x22f   :  { %v202_v24 = vadd.f32 %v200_v23, %v192_v22 }
 0x231   :  { %2515 = vtanh.f32 %v202_v24  ;;  %v299_v40 = vrot.slane %v202_v24, 6 }
 0x23b   :  { %v2516_v25 = vpop.eup %2515 }
 0x23c   :  { %205 = vrot.lane.b32.xlu1 %v2516_v25, %s2813_s5 }
 0x2ae   :  { %v206_v26 = vpop.permute.xlu1 %205 }
 0x2af   :  { %v208_v27 = vmul.f32 %v2514_v18, %v206_v26 }
 0x2b1   :  { %210 = vrot.lane.b32.xlu0 %v208_v27, %s2802_s15 }
 0x323   :  { %v211_v28 = vpop.permute.xlu0 %210 }
 0x324   :  { %214 = vst.msk [vmem:[#allocation2] sm:$0x3] %vm213_vm2, %v211_v28  ;;  %2221 = vmatmul.mubr.msk.f32.vlgmr.msra.gmra.mrb[0].mxu1 %vm106_vm1, %v211_v28 }
 0x325   :  { %2408 = vmatpush3.bf16.msra.mxu1 %v2943_v5  ;;  %2242 = vmatprep.mubr.msk.f32.mxu1 %vm2811_vm0, %v2812_v1 }
 0x326   :  { %2409 = vmatprep.subr.bf16.mxu1 %v2810_v0 }
 0x329   :  { %2411 = vmatpush3.bf16.msra.mxu1 %v2946_v7 }
 0x32a   :  { %2418 = vmatprep.subr.bf16.mxu1 %v2810_v0 }
 0x3f7   :  { %v283_v29 = vpop.f32.mrb[0].mxu1 }
 0x3f8   :  { %v288_v30 = vrot.slane %v283_v29, 6  ;;  %v2222_v31 = vpop.f32.mrb[1].mxu1  ;;  %v3025_v29 = vld [vmem:[#allocation3 + $0x8] sm:$0xff] }
 0x3fa   :  { %v290_v32 = vadd.f32 %v288_v30, %v2962_v9 }
 0x3fc   :  { %2517 = vtanh.f32 %v290_v32  ;;  %v2082_v34 = vmul.f32 -1.442695, %v290_v32 }
 0x3fe   :  { %2519 = vpow2.f32 %v2082_v34 }
 0x406   :  { %v2518_v33 = vpop.eup %2517 }
 0x407   :  { %303 = vrot.lane.b32.xlu1 %v2518_v33, %s2813_s5 }
 0x408   :  { %v2520_v35 = vpop.eup %2519 }
 0x409   :  { %v294_v36 = vadd.f32 1.0, %v2520_v35 }
 0x40b   :  { %2521 = vrcp.f32 %v294_v36 }
 0x415   :  { %v2522_v37 = vpop.eup %2521 }
 0x416   :  { %v301_v41 = vmul.f32 %v2522_v37, %v299_v40 }
 0x479   :  { %v304_v38 = vpop.permute.xlu1 %303 }
 0x47a   :  { %v306_v39 = vmul.f32 %v2522_v37, %v304_v38 }
 0x47c   :  { %308 = vrot.lane.b32.xlu0 %v306_v39, %s2802_s15 }
 0x4ee   :  { %v309_v42 = vpop.permute.xlu0 %308 }
 0x4ef   :  { %v311_v43 = vadd.f32 %v309_v42, %v301_v41 }
 0x4f1   :  { %2523 = vtanh.f32 %v311_v43  ;;  %v411_v60 = vrot.slane %v311_v43, 6 }
 0x4fb   :  { %v2524_v44 = vpop.eup %2523 }
 0x4fc   :  { %314 = vrot.lane.b32.xlu1 %v2524_v44, %s2813_s5 }
 0x56e   :  { %v315_v45 = vpop.permute.xlu1 %314 }
 0x56f   :  { %v2985_v46 = vmul.f32 %v2522_v37, %v315_v45 }
 0x571   :  { %v324_v47 = vrot.slane %v2985_v46, 2 }
 0x573   :  { %325 = vrot.lane.b32.xlu0 %v324_v47, %s2802_s15 }
 0x5e5   :  { %v326_v48 = vpop.permute.xlu0 %325 }
 0x5e6   :  { %2232 = vmatmul.mubr.msk.f32.vlgmr.msra.gmra.mrb[2].mxu0 %vm106_vm1, %v326_v48 }
 0x5e7   :  { %2414 = vmatpush3.bf16.msra.mxu0 %v2943_v5  ;;  %2253 = vmatprep.mubr.msk.f32.mxu0 %vm2811_vm0, %v2812_v1 }
 0x5e8   :  { %2415 = vmatprep.subr.bf16.mxu0 %v2810_v0 }
 0x5eb   :  { %2417 = vmatpush3.bf16.msra.mxu0 %v2946_v7 }
 0x5ec   :  { %2424 = vmatprep.subr.bf16.mxu0 %v2810_v0 }
 0x6b9   :  { %v395_v49 = vpop.f32.mrb[2].mxu0 }
 0x6ba   :  { %v400_v50 = vrot.slane %v395_v49, 4  ;;  %v2233_v51 = vpop.f32.mrb[3].mxu0 }
 0x6bc   :  { %v402_v52 = vadd.f32 %v400_v50, %v2962_v9 }
 0x6be   :  { %2525 = vtanh.f32 %v402_v52  ;;  %v2084_v54 = vmul.f32 -1.442695, %v402_v52 }
 0x6c0   :  { %2527 = vpow2.f32 %v2084_v54 }
 0x6c8   :  { %v2526_v53 = vpop.eup %2525 }
 0x6c9   :  { %415 = vrot.lane.b32.xlu1 %v2526_v53, %s2813_s5 }
 0x6ca   :  { %v2528_v55 = vpop.eup %2527 }
 0x6cb   :  { %v406_v56 = vadd.f32 1.0, %v2528_v55 }
 0x6cd   :  { %2529 = vrcp.f32 %v406_v56 }
 0x6d7   :  { %v2530_v57 = vpop.eup %2529 }
 0x6d8   :  { %v413_v61 = vmul.f32 %v2530_v57, %v411_v60 }
 0x73b   :  { %v416_v58 = vpop.permute.xlu1 %415 }
 0x73c   :  { %v418_v59 = vmul.f32 %v2530_v57, %v416_v58 }
 0x73e   :  { %420 = vrot.lane.b32.xlu0 %v418_v59, %s2802_s15 }
 0x7b0   :  { %v421_v62 = vpop.permute.xlu0 %420 }
 0x7b1   :  { %v423_v63 = vadd.f32 %v421_v62, %v413_v61 }
 0x7b3   :  { %2531 = vtanh.f32 %v423_v63  ;;  %v523_v21 = vrot.slane %v423_v63, 6 }
 0x7bd   :  { %v2532_v2 = vpop.eup %2531 }
 0x7be   :  { %426 = vrot.lane.b32.xlu1 %v2532_v2, %s2813_s5 }
 0x830   :  { %v427_v3 = vpop.permute.xlu1 %426 }
 0x831   :  { %v3000_v4 = vmul.f32 %v2530_v57, %v427_v3 }
 0x833   :  { %v436_v6 = vrot.slane %v3000_v4, 4 }
 0x835   :  { %437 = vrot.lane.b32.xlu0 %v436_v6, %s2802_s15 }
 0x8a7   :  { %v438_v8 = vpop.permute.xlu0 %437 }
 0x8a8   :  { %2243 = vmatmul.mubr.msk.f32.vlgmr.msra.gmra.mrb[2].mxu1 %vm106_vm1, %v438_v8 }
 0x8a9   :  { %2420 = vmatpush3.bf16.msra.mxu1 %v2943_v5  ;;  %2264 = vmatprep.mubr.msk.f32.mxu1 %vm2811_vm0, %v2812_v1 }
 0x8aa   :  { %2421 = vmatprep.subr.bf16.mxu1 %v2810_v0 }
 0x8ad   :  { %2423 = vmatpush3.bf16.msra.mxu1 %v2946_v7 }
 0x8ae   :  { %2430 = vmatprep.subr.bf16.mxu1 %v2810_v0 }
 0x97b   :  { %v507_v10 = vpop.f32.mrb[2].mxu1 }
 0x97c   :  { %v512_v11 = vrot.slane %v507_v10, 2  ;;  %v2244_v12 = vpop.f32.mrb[3].mxu1 }
 0x97e   :  { %v514_v13 = vadd.f32 %v512_v11, %v2962_v9 }
 0x980   :  { %2533 = vtanh.f32 %v514_v13  ;;  %v2086_v15 = vmul.f32 -1.442695, %v514_v13 }
 0x982   :  { %2535 = vpow2.f32 %v2086_v15 }
 0x98a   :  { %v2534_v14 = vpop.eup %2533 }
 0x98b   :  { %527 = vrot.lane.b32.xlu1 %v2534_v14, %s2813_s5 }
 0x98c   :  { %v2536_v16 = vpop.eup %2535 }
 0x98d   :  { %v518_v17 = vadd.f32 1.0, %v2536_v16 }
 0x98f   :  { %2537 = vrcp.f32 %v518_v17 }
 0x999   :  { %v2538_v18 = vpop.eup %2537 }
 0x99a   :  { %v525_v22 = vmul.f32 %v2538_v18, %v523_v21 }
 0x9fd   :  { %v528_v19 = vpop.permute.xlu1 %527 }
 0x9fe   :  { %v530_v20 = vmul.f32 %v2538_v18, %v528_v19 }
 0xa00   :  { %532 = vrot.lane.b32.xlu0 %v530_v20, %s2802_s15 }
 0xa72   :  { %v533_v23 = vpop.permute.xlu0 %532 }
 0xa73   :  { %v535_v24 = vadd.f32 %v533_v23, %v525_v22 }
 0xa75   :  { %2539 = vtanh.f32 %v535_v24  ;;  %v632_v40 = vrot.slane %v535_v24, 6 }
 0xa7f   :  { %v2540_v9 = vpop.eup %2539 }
 0xa80   :  { %538 = vrot.lane.b32.xlu1 %v2540_v9, %s2813_s5 }
 0xaf2   :  { %v539_v25 = vpop.permute.xlu1 %538 }
 0xaf3   :  { %v3015_v26 = vmul.f32 %v2538_v18, %v539_v25 }
 0xaf5   :  { %v548_v27 = vrot.slane %v3015_v26, 6 }
 0xaf7   :  { %549 = vrot.lane.b32.xlu0 %v548_v27, %s2802_s15 }
 0xb69   :  { %v550_v28 = vpop.permute.xlu0 %549 }
 0xb6a   :  { %2254 = vmatmul.mubr.msk.f32.vlgmr.msra.gmra.mrb[4].mxu0 %vm106_vm1, %v550_v28 }
 0xb6b   :  { %2426 = vmatpush3.bf16.msra.mxu0 %v2943_v5  ;;  %2275 = vmatprep.mubr.msk.f32.mxu0 %vm2811_vm0, %v2812_v1 }
 0xb6c   :  { %2427 = vmatprep.subr.bf16.mxu0 %v2810_v0 }
 0xb6f   :  { %2429 = vmatpush3.bf16.msra.mxu0 %v2946_v7 }
 0xc3d   :  { %v619_v30 = vpop.f32.mrb[4].mxu0 }
 0xc3e   :  { %v623_v31 = vadd.f32 %v619_v30, %v3025_v29  ;;  %v2255_v32 = vpop.f32.mrb[5].mxu0 }
 0xc40   :  { %2541 = vtanh.f32 %v623_v31  ;;  %v2088_v34 = vmul.f32 -1.442695, %v623_v31 }
 0xc42   :  { %2543 = vpow2.f32 %v2088_v34 }
 0xc4a   :  { %v2542_v33 = vpop.eup %2541 }
 0xc4b   :  { %636 = vrot.lane.b32.xlu1 %v2542_v33, %s2813_s5 }
 0xc4c   :  { %v2544_v35 = vpop.eup %2543 }
 0xc4d   :  { %v627_v36 = vadd.f32 1.0, %v2544_v35 }
 0xc4f   :  { %2545 = vrcp.f32 %v627_v36 }
 0xc59   :  { %v2546_v37 = vpop.eup %2545 }
 0xc5a   :  { %v634_v41 = vmul.f32 %v2546_v37, %v632_v40 }
 0xcbd   :  { %v637_v38 = vpop.permute.xlu1 %636 }
 0xcbe   :  { %v639_v39 = vmul.f32 %v2546_v37, %v637_v38 }
 0xcc0   :  { %641 = vrot.lane.b32.xlu0 %v639_v39, %s2802_s15 }
 0xd32   :  { %v642_v42 = vpop.permute.xlu0 %641 }
 0xd33   :  { %v644_v43 = vadd.f32 %v642_v42, %v634_v41 }
 0xd35   :  { %2547 = vtanh.f32 %v644_v43 }
 0xd3f   :  { %v2548_v44 = vpop.eup %2547 }
 0xd40   :  { %647 = vrot.lane.b32.xlu1 %v2548_v44, %s2813_s5 }
 0xdb2   :  { %v648_v45 = vpop.permute.xlu1 %647 }
 0xdb3   :  { %v650_v47 = vmul.f32 %v2546_v37, %v648_v45 }
 0xdb5   :  { %652 = vrot.lane.b32.xlu0 %v650_v47, %s2802_s15  ;;  %v993_v47 = vld [vmem:[#allocation11] sm:$0xff] }
 0xe27   :  { %v653_v48 = vpop.permute.xlu0 %652 }
 0xe28   :  { %655 = vst.msk [vmem:[#allocation2 + $0x8] sm:$0x3] %vm213_vm2, %v653_v48  ;;  %2265 = vmatmul.mubr.msk.f32.vlgmr.msra.gmra.mrb[4].mxu1 %vm106_vm1, %v653_v48  ;;  %v994_v48 = vld [vmem:[#allocation11 + $0x8] sm:$0xff] }
 0xe29   :  { %2432 = vmatpush3.bf16.msra.mxu1 %v2943_v5  ;;  %2286 = vmatprep.mubr.msk.f32.mxu1 %vm2811_vm0, %v2812_v1 }
 0xe2a   :  { %2433 = vmatprep.subr.bf16.mxu1 %v2810_v0 }
 0xe2d   :  { %2435 = vmatpush3.bf16.msra.mxu1 %v2946_v7  ;;  %v740_v7 = vrot.slane %v644_v43, 6 }
 0xe2e   :  { %2444 = vmatprep.subr.bf16.mxu1 %v2810_v0 }
 0xefb   :  { %v724_v49 = vpop.f32.mrb[4].mxu1 }
 0xefc   :  { %v729_v50 = vrot.slane %v724_v49, 6  ;;  %v2266_v51 = vpop.f32.mrb[5].mxu1  ;;  %v2436_v49 = vpack.c.bf16 %v994_v48, %v993_v47 }
 0xefd   :  { %v1092_v51 = vld [vmem:[#allocation9 + $0x8] sm:$0xff] }
 0xefe   :  { %v731_v52 = vadd.f32 %v729_v50, %v3025_v29  ;;  %2437 = vmatprep.subr.bf16.mxu0 %v2436_v49  ;;  %v1091_v50 = vld [vmem:[#allocation9] sm:$0xff] }
 0xf00   :  { %2549 = vtanh.f32 %v731_v52  ;;  %v2090_v54 = vmul.f32 -1.442695, %v731_v52  ;;  %v995_v52 = vld [vmem:[#allocation11 + $0x10] sm:$0xff] }
 0xf02   :  { %2551 = vpow2.f32 %v2090_v54  ;;  %v996_v54 = vld [vmem:[#allocation11 + $0x18] sm:$0xff] }
 0xf0a   :  { %v2550_v53 = vpop.eup %2549 }
 0xf0b   :  { %744 = vrot.lane.b32.xlu1 %v2550_v53, %s2813_s5  ;;  %v3076_v53 = vpack.c.bf16 %v1092_v51, %v1091_v50 }
 0xf0c   :  { %v2552_v5 = vpop.eup %2551 }
 0xf0d   :  { %v735_v55 = vadd.f32 1.0, %v2552_v5  ;;  %v1093_v5 = vld [vmem:[#allocation9 + $0x10] sm:$0xff] }
 0xf0f   :  { %2553 = vrcp.f32 %v735_v55  ;;  %v1094_v55 = vld [vmem:[#allocation9 + $0x18] sm:$0xff] }
 0xf19   :  { %v2554_v56 = vpop.eup %2553 }
 0xf1a   :  { %v742_v59 = vmul.f32 %v2554_v56, %v740_v7 }
 0xf7d   :  { %v745_v57 = vpop.permute.xlu1 %744 }
 0xf7e   :  { %v747_v58 = vmul.f32 %v2554_v56, %v745_v57  ;;  %v1088_v57 = vld [vmem:[#allocation6 + $0x2] sm:$0x3] }
 0xf80   :  { %749 = vrot.lane.b32.xlu0 %v747_v58, %s2802_s15 }
 0xff2   :  { %v750_v60 = vpop.permute.xlu0 %749 }
 0xff3   :  { %v752_v61 = vadd.f32 %v750_v60, %v742_v59  ;;  %v2098_v60 = vld [vmem:[%s3250_s2 + $0x2] sm:$0x3] }
 0xff5   :  { %2555 = vtanh.f32 %v752_v61  ;;  %v851_v20 = vrot.slane %v752_v61, 6 }
 0xfff   :  { %v2556_v62 = vpop.eup %2555 }
0x1000   :  { %755 = vrot.lane.b32.xlu1 %v2556_v62, %s2813_s5 }
0x1072   :  { %v756_v63 = vpop.permute.xlu1 %755 }
0x1073   :  { %v3044_v2 = vmul.f32 %v2554_v56, %v756_v63  ;;  %v2440_v56 = vpack.c.bf16 %v996_v54, %v995_v52 }
0x1075   :  { %v764_v3 = vrot.slane %v3044_v2, 2 }
0x1077   :  { %765 = vrot.lane.b32.xlu0 %v764_v3, %s2802_s15 }
0x10e9   :  { %v766_v6 = vpop.permute.xlu0 %765 }
0x10ea   :  { %2276 = vmatmul.mubr.msk.f32.vlgmr.msra.gmra.mrb[6].mxu0 %vm106_vm1, %v766_v6 }
0x10eb   :  { %2439 = vmatpush3.bf16.msra.mxu0 %v2436_v49 }
0x10ec   :  { %2441 = vmatprep.subr.bf16.mxu0 %v2440_v56 }
0x10ef   :  { %2443 = vmatpush3.bf16.msra.mxu0 %v2440_v56 }
0x10f0   :  { %2450 = vmatprep.subr.bf16.mxu0 %v2810_v0 }
0x11bd   :  { %v835_v8 = vpop.f32.mrb[6].mxu0 }
0x11be   :  { %v840_v10 = vrot.slane %v835_v8, 4  ;;  %v2277_v11 = vpop.f32.mrb[7].mxu0  ;;  %v2095_v8 = vld [vmem:[%s3254_s6] ss:$0 sm:$0xff]  ;;  %s2815_s6 = smov 96  }
0x11c0   :  { %v842_v12 = vadd.f32 %v840_v10, %v3025_v29 }
0x11c2   :  { %2557 = vtanh.f32 %v842_v12  ;;  %v2092_v14 = vmul.f32 -1.442695, %v842_v12 }
0x11c4   :  { %2559 = vpow2.f32 %v2092_v14 }
0x11cc   :  { %v2558_v13 = vpop.eup %2557 }
0x11cd   :  { %855 = vrot.lane.b32.xlu1 %v2558_v13, %s2813_s5 }
0x11ce   :  { %v2560_v15 = vpop.eup %2559 }
0x11cf   :  { %v846_v16 = vadd.f32 1.0, %v2560_v15 }
0x11d1   :  { %2561 = vrcp.f32 %v846_v16 }
0x11db   :  { %v2562_v17 = vpop.eup %2561 }
0x11dc   :  { %v853_v21 = vmul.f32 %v2562_v17, %v851_v20 }
0x123f   :  { %v856_v18 = vpop.permute.xlu1 %855 }
0x1240   :  { %v858_v19 = vmul.f32 %v2562_v17, %v856_v18 }
0x1242   :  { %860 = vrot.lane.b32.xlu0 %v858_v19, %s2802_s15 }
0x12b4   :  { %v861_v22 = vpop.permute.xlu0 %860 }
0x12b5   :  { %v863_v23 = vadd.f32 %v861_v22, %v853_v21 }
0x12b7   :  { %2563 = vtanh.f32 %v863_v23 }
0x12c1   :  { %v2564_v24 = vpop.eup %2563 }
0x12c2   :  { %866 = vrot.lane.b32.xlu1 %v2564_v24, %s2813_s5 }
0x1334   :  { %v867_v9 = vpop.permute.xlu1 %866 }
0x1335   :  { %v869_v25 = vmul.f32 %v2562_v17, %v867_v9 }
0x1337   :  { %v875_v27 = vrot.slane %v869_v25, 4 }
0x1339   :  { %876 = vrot.lane.b32.xlu0 %v875_v27, %s2802_s15 }
0x13ab   :  { %v877_v28 = vpop.permute.xlu0 %876 }
0x13ac   :  { %2287 = vmatmul.mubr.msk.f32.vlgmr.msra.gmra.mrb[6].mxu1 %vm106_vm1, %v877_v28 }
0x13ad   :  { %2308 = vmatprep.mubr.msk.f32.mxu1 %vm2811_vm0, %v2812_v1  ;;  %2446 = vmatpush3.bf16.msra.mxu1 %v3076_v53 }
0x13ae   :  { %2447 = vmatprep.subr.bf16.mxu1 %v2810_v0 }
0x147f   :  { %v946_v30 = vpop.f32.mrb[6].mxu1 }
0x1480   :  { %v951_v31 = vrot.slane %v946_v30, 2  ;;  %v2288_v32 = vpop.f32.mrb[7].mxu1 }
0x1482   :  { %v953_v33 = vadd.f32 %v951_v31, %v3025_v29  ;;  %v962_v29 = vrot.slane %v863_v23, 6 }
0x1484   :  { %2565 = vtanh.f32 %v953_v33  ;;  %v2094_v35 = vmul.f32 -1.442695, %v953_v33 }
0x1486   :  { %2567 = vpow2.f32 %v2094_v35 }
0x148e   :  { %v2566_v34 = vpop.eup %2565 }
0x148f   :  { %966 = vrot.lane.b32.xlu1 %v2566_v34, %s2813_s5 }
0x1490   :  { %v2568_v36 = vpop.eup %2567 }
0x1491   :  { %v957_v37 = vadd.f32 1.0, %v2568_v36 }
0x1493   :  { %2569 = vrcp.f32 %v957_v37 }
0x149d   :  { %v2570_v38 = vpop.eup %2569 }
0x149e   :  { %v964_v41 = vmul.f32 %v2570_v38, %v962_v29 }
0x1501   :  { %v967_v39 = vpop.permute.xlu1 %966 }
0x1502   :  { %v969_v40 = vmul.f32 %v2570_v38, %v967_v39 }
0x1504   :  { %971 = vrot.lane.b32.xlu0 %v969_v40, %s2802_s15 }
0x1508   :  { %319 = vrot.lane.b32.xlu0 %v2985_v46, %s2802_s15 }
0x150c   :  { %543 = vrot.lane.b32.xlu0 %v3015_v26, %s2802_s15 }
0x1510   :  { %871 = vrot.lane.b32.xlu0 %v869_v25, %s2802_s15 }
0x1576   :  { %v972_v42 = vpop.permute.xlu0 %971 }
0x1577   :  { %v3065_v43 = vadd.f32 %v972_v42, %v964_v41 }
0x1579   :  { %2571 = vtanh.f32 %v3065_v43 }
0x157a   :  { %v320_v44 = vpop.permute.xlu0 %319 }
0x157b   :  { %323 = vst.msk [vmem:[#allocation2] sm:$0xc] %vm322_vm3, %v320_v44 }
0x157e   :  { %v544_v45 = vpop.permute.xlu0 %543 }
0x157f   :  { %547 = vst.msk [vmem:[#allocation2] sm:$0xc0] %vm546_vm4, %v544_v45 }
0x1582   :  { %v872_v46 = vpop.permute.xlu0 %871 }
0x1583   :  { %v2572_v26 = vpop.eup %2571  ;;  %874 = vst.msk [vmem:[#allocation2 + $0x8] sm:$0x30] %vm434_vm5, %v872_v46 }
0x1584   :  { %977 = vrot.lane.b32.xlu1 %v2572_v26, %s2813_s5 }
0x1588   :  { %431 = vrot.lane.b32.xlu1 %v3000_v4, %s2802_s15  ;;  %v3079_v4 = vpack.c.bf16 %v1094_v55, %v1093_v5 }
0x158a   :  { %2449 = vmatpush3.bf16.msra.mxu1 %v3079_v4 }
0x158b   :  { %2456 = vmatprep.subr.bf16.mxu1 %v2810_v0 }
0x158c   :  { %760 = vrot.lane.b32.xlu1 %v3044_v2, %s2802_s15 }
0x158d   :  { %2309 = vmatmul.mubr.msk.f32.vlgmr.msra.gmra.mrb[8].mxu1 %vm106_vm1, %v1088_v57 }
0x158e   :  { %2458 = vmatpush3.bf16.msra.mxu1 %v3076_v53  ;;  %2330 = vmatprep.mubr.msk.f32.mxu1 %vm2811_vm0, %v2812_v1 }
0x158f   :  { %2459 = vmatprep.subr.bf16.mxu1 %v2810_v0 }
0x1592   :  { %2461 = vmatpush3.bf16.msra.mxu1 %v3079_v4 }
0x1593   :  { %2468 = vmatprep.subr.bf16.mxu1 %v2810_v0 }
0x15f6   :  { %v978_v58 = vpop.permute.xlu1 %977 }
0x15f7   :  { %v980_v7 = vmul.f32 %v2570_v38, %v978_v58 }
0x15f9   :  { %982 = vrot.lane.b32.xlu1 %v980_v7, %s2802_s15 }
0x15fa   :  { %v432_v59 = vpop.permute.xlu1 %431 }
0x15fb   :  { %435 = vst.msk [vmem:[#allocation2] sm:$0x30] %vm434_vm5, %v432_v59 }
0x15fd   :  { %1177 = vrot.lane.b32.xlu1 %v2098_v60, %s2802_s15 }
0x15fe   :  { %v761_v61 = vpop.permute.xlu1 %760 }
0x15ff   :  { %763 = vst.msk [vmem:[#allocation2 + $0x8] sm:$0xc] %vm322_vm3, %v761_v61 }
0x1602   :  { %v998_v62 = vld [vmem:[#allocation2] sm:$0xff] }
0x1603   :  { %2297 = vmatprep.mubr.msk.f32.mxu0 %vm106_vm1, %v998_v62 }
0x1660   :  { %v1164_v3 = vpop.f32.mrb[8].mxu1 }
0x1661   :  { %v2310_v6 = vpop.f32.mrb[9].mxu1 }
0x166b   :  { %v983_v63 = vpop.permute.xlu1 %982 }
0x166c   :  { %985 = vst.msk [vmem:[#allocation2 + $0x8] sm:$0xc0] %vm546_vm4, %v983_v63  ;;  %986 = vst.msk [vmem:[#allocation13 - $0x6] sm:$0xc0] %vm546_vm4, %v983_v63 }
0x166f   :  { %v1178_v22 = vpop.permute.xlu1 %1177 }
0x1673   :  { %v999_v2 = vld [vmem:[#allocation2 + $0x8] sm:$0xff] }
0x1674   :  { %2298 = vmatmul.mubr.msk.f32.vlgmr.msra.gmra.mrb[8].mxu0 %vm106_vm1, %v999_v2 }
0x1675   :  { %2452 = vmatpush3.bf16.msra.mxu0 %v3076_v53  ;;  %2319 = vmatprep.mubr.msk.f32.mxu0 %vm2811_vm0, %v2812_v1 }
0x1676   :  { %2453 = vmatprep.subr.bf16.mxu0 %v2810_v0 }
0x1679   :  { %2455 = vmatpush3.bf16.msra.mxu0 %v3079_v4 }
0x167a   :  { %2462 = vmatprep.subr.bf16.mxu0 %v2810_v0 }
0x1747   :  { %v2299_v10 = vpop.f32.mrb[8].mxu0 }
0x1748   :  { %v3112_v11 = vadd.f32 %v2299_v10, %v2095_v8  ;;  %v1078_v12 = vpop.f32.mrb[9].mxu0 }
0x1749   :  { %v3114_v13 = vadd.f32 %v2095_v8, %v1078_v12 }
0x174b   :  { %v1168_v14 = vadd.f32 %v1164_v3, %v3114_v13 }
0x174d   :  { %2573 = vtanh.f32 %v1168_v14  ;;  %v2100_v16 = vmul.f32 -1.442695, %v1168_v14 }
0x174f   :  { %2575 = vpow2.f32 %v2100_v16 }
0x1757   :  { %v2574_v15 = vpop.eup %2573 }
0x1758   :  { %1182 = vrot.lane.b32.xlu0 %v2574_v15, %s2813_s5 }
0x1759   :  { %v2576_v17 = vpop.eup %2575 }
0x175a   :  { %v1172_v18 = vadd.f32 1.0, %v2576_v17 }
0x175c   :  { %2577 = vrcp.f32 %v1172_v18 }
0x1766   :  { %v2578_v19 = vpop.eup %2577 }
0x1767   :  { %v1180_v23 = vmul.f32 %v2578_v19, %v1178_v22 }
0x17ca   :  { %v1183_v20 = vpop.permute.xlu0 %1182 }
0x17cb   :  { %v1185_v21 = vmul.f32 %v2578_v19, %v1183_v20 }
0x17cd   :  { %1187 = vrot.lane.b32.xlu0 %v1185_v21, %s2802_s15 }
0x183f   :  { %v1188_v24 = vpop.permute.xlu0 %1187 }
0x1840   :  { %v1190_v9 = vadd.f32 %v1188_v24, %v1180_v23 }
0x1842   :  { %2579 = vtanh.f32 %v1190_v9  ;;  %v1295_v41 = vrot.slane %v1190_v9, 6 }
0x184c   :  { %v2580_v25 = vpop.eup %2579 }
0x184d   :  { %1193 = vrot.lane.b32.xlu1 %v2580_v25, %s2813_s5 }
0x18bf   :  { %v1194_v27 = vpop.permute.xlu1 %1193 }
0x18c0   :  { %v3120_v28 = vmul.f32 %v2578_v19, %v1194_v27 }
0x18c2   :  { %1209 = vrot.lane.b32.xlu0 %v3120_v28, %s2802_s15 }
0x1934   :  { %v1210_v30 = vpop.permute.xlu0 %1209 }
0x1935   :  { %2320 = vmatmul.mubr.msk.f32.vlgmr.msra.gmra.mrb[10].mxu0 %vm106_vm1, %v1210_v30 }
0x1936   :  { %2464 = vmatpush3.bf16.msra.mxu0 %v3076_v53  ;;  %2341 = vmatprep.mubr.msk.f32.mxu0 %vm2811_vm0, %v2812_v1 }
0x1937   :  { %2465 = vmatprep.subr.bf16.mxu0 %v2810_v0 }
0x193a   :  { %2467 = vmatpush3.bf16.msra.mxu0 %v3079_v4 }
0x193b   :  { %2474 = vmatprep.subr.bf16.mxu0 %v2810_v0 }
0x1a08   :  { %v1279_v31 = vpop.f32.mrb[10].mxu0 }
0x1a09   :  { %v1284_v32 = vrot.slane %v1279_v31, 6  ;;  %v2321_v33 = vpop.f32.mrb[11].mxu0 }
0x1a0b   :  { %v1286_v34 = vadd.f32 %v1284_v32, %v3114_v13 }
0x1a0d   :  { %2581 = vtanh.f32 %v1286_v34  ;;  %v2102_v36 = vmul.f32 -1.442695, %v1286_v34 }
0x1a0f   :  { %2583 = vpow2.f32 %v2102_v36 }
0x1a17   :  { %v2582_v35 = vpop.eup %2581 }
0x1a18   :  { %1299 = vrot.lane.b32.xlu1 %v2582_v35, %s2813_s5 }
0x1a19   :  { %v2584_v37 = vpop.eup %2583 }
0x1a1a   :  { %v1290_v38 = vadd.f32 1.0, %v2584_v37 }
0x1a1c   :  { %2585 = vrcp.f32 %v1290_v38 }
0x1a26   :  { %v2586_v39 = vpop.eup %2585 }
0x1a27   :  { %v1297_v42 = vmul.f32 %v2586_v39, %v1295_v41 }
0x1a8a   :  { %v1300_v40 = vpop.permute.xlu1 %1299 }
0x1a8b   :  { %v1302_v29 = vmul.f32 %v2586_v39, %v1300_v40 }
0x1a8d   :  { %1304 = vrot.lane.b32.xlu0 %v1302_v29, %s2802_s15 }
0x1aff   :  { %v1305_v44 = vpop.permute.xlu0 %1304 }
0x1b00   :  { %v1307_v45 = vadd.f32 %v1305_v44, %v1297_v42 }
0x1b02   :  { %2587 = vtanh.f32 %v1307_v45  ;;  %v1415_v60 = vrot.slane %v1307_v45, 6 }
0x1b0c   :  { %v2588_v46 = vpop.eup %2587 }
0x1b0d   :  { %1310 = vrot.lane.b32.xlu1 %v2588_v46, %s2813_s5 }
0x1b7f   :  { %v1311_v26 = vpop.permute.xlu1 %1310 }
0x1b80   :  { %v3135_v47 = vmul.f32 %v2586_v39, %v1311_v26 }
0x1b82   :  { %v1328_v48 = vrot.slane %v3135_v47, 2 }
0x1b84   :  { %1329 = vrot.lane.b32.xlu0 %v1328_v48, %s2802_s15 }
0x1bf6   :  { %v1330_v49 = vpop.permute.xlu0 %1329 }
0x1bf7   :  { %2331 = vmatmul.mubr.msk.f32.vlgmr.msra.gmra.mrb[10].mxu1 %vm106_vm1, %v1330_v49 }
0x1bf8   :  { %2470 = vmatpush3.bf16.msra.mxu1 %v3076_v53  ;;  %2352 = vmatprep.mubr.msk.f32.mxu1 %vm2811_vm0, %v2812_v1 }
0x1bf9   :  { %2471 = vmatprep.subr.bf16.mxu1 %v2810_v0 }
0x1bfc   :  { %2473 = vmatpush3.bf16.msra.mxu1 %v3079_v4 }
0x1bfd   :  { %2480 = vmatprep.subr.bf16.mxu1 %v2810_v0 }
0x1cca   :  { %v1399_v50 = vpop.f32.mrb[10].mxu1 }
0x1ccb   :  { %v1404_v51 = vrot.slane %v1399_v50, 4  ;;  %v2332_v52 = vpop.f32.mrb[11].mxu1 }
0x1ccd   :  { %v1406_v54 = vadd.f32 %v1404_v51, %v3114_v13 }
0x1ccf   :  { %2589 = vtanh.f32 %v1406_v54  ;;  %v2104_v55 = vmul.f32 -1.442695, %v1406_v54 }
0x1cd1   :  { %2591 = vpow2.f32 %v2104_v55 }
0x1cd9   :  { %v2590_v5 = vpop.eup %2589 }
0x1cda   :  { %1419 = vrot.lane.b32.xlu1 %v2590_v5, %s2813_s5 }
0x1cdb   :  { %v2592_v56 = vpop.eup %2591 }
0x1cdc   :  { %v1410_v57 = vadd.f32 1.0, %v2592_v56 }
0x1cde   :  { %2593 = vrcp.f32 %v1410_v57 }
0x1ce8   :  { %v2594_v58 = vpop.eup %2593 }
0x1ce9   :  { %v1417_v61 = vmul.f32 %v2594_v58, %v1415_v60 }
0x1d4c   :  { %v1420_v7 = vpop.permute.xlu1 %1419 }
0x1d4d   :  { %v1422_v59 = vmul.f32 %v2594_v58, %v1420_v7 }
0x1d4f   :  { %1424 = vrot.lane.b32.xlu0 %v1422_v59, %s2802_s15 }
0x1dc1   :  { %v1425_v62 = vpop.permute.xlu0 %1424 }
0x1dc2   :  { %v1427_v63 = vadd.f32 %v1425_v62, %v1417_v61 }
0x1dc4   :  { %2595 = vtanh.f32 %v1427_v63  ;;  %v1535_v24 = vrot.slane %v1427_v63, 6 }
0x1dce   :  { %v2596_v2 = vpop.eup %2595 }
0x1dcf   :  { %1430 = vrot.lane.b32.xlu1 %v2596_v2, %s2813_s5 }
0x1e41   :  { %v1431_v3 = vpop.permute.xlu1 %1430 }
0x1e42   :  { %v3150_v6 = vmul.f32 %v2594_v58, %v1431_v3 }
0x1e44   :  { %v1448_v8 = vrot.slane %v3150_v6, 4 }
0x1e46   :  { %1449 = vrot.lane.b32.xlu0 %v1448_v8, %s2802_s15 }
0x1eb8   :  { %v1450_v10 = vpop.permute.xlu0 %1449 }
0x1eb9   :  { %2342 = vmatmul.mubr.msk.f32.vlgmr.msra.gmra.mrb[12].mxu0 %vm106_vm1, %v1450_v10 }
0x1eba   :  { %2476 = vmatpush3.bf16.msra.mxu0 %v3076_v53  ;;  %2363 = vmatprep.mubr.msk.f32.mxu0 %vm2811_vm0, %v2812_v1 }
0x1ebb   :  { %2477 = vmatprep.subr.bf16.mxu0 %v2810_v0 }
0x1ebe   :  { %2479 = vmatpush3.bf16.msra.mxu0 %v3079_v4 }
0x1ebf   :  { %2486 = vmatprep.subr.bf16.mxu0 %v2810_v0 }
0x1f8c   :  { %v1519_v12 = vpop.f32.mrb[12].mxu0 }
0x1f8d   :  { %v1524_v14 = vrot.slane %v1519_v12, 2  ;;  %v2343_v15 = vpop.f32.mrb[13].mxu0 }
0x1f8f   :  { %v1526_v16 = vadd.f32 %v1524_v14, %v3114_v13 }
0x1f91   :  { %2597 = vtanh.f32 %v1526_v16  ;;  %v2106_v18 = vmul.f32 -1.442695, %v1526_v16 }
0x1f93   :  { %2599 = vpow2.f32 %v2106_v18 }
0x1f9b   :  { %v2598_v17 = vpop.eup %2597 }
0x1f9c   :  { %1539 = vrot.lane.b32.xlu1 %v2598_v17, %s2813_s5 }
0x1f9d   :  { %v2600_v19 = vpop.eup %2599 }
0x1f9e   :  { %v1530_v20 = vadd.f32 1.0, %v2600_v19 }
0x1fa0   :  { %2601 = vrcp.f32 %v1530_v20 }
0x1faa   :  { %v2602_v21 = vpop.eup %2601 }
0x1fab   :  { %v1537_v9 = vmul.f32 %v2602_v21, %v1535_v24 }
0x200e   :  { %v1540_v22 = vpop.permute.xlu1 %1539 }
0x200f   :  { %v1542_v23 = vmul.f32 %v2602_v21, %v1540_v22 }
0x2011   :  { %1544 = vrot.lane.b32.xlu0 %v1542_v23, %s2802_s15 }
0x2083   :  { %v1545_v25 = vpop.permute.xlu0 %1544 }
0x2084   :  { %v1547_v27 = vadd.f32 %v1545_v25, %v1537_v9 }
0x2086   :  { %2603 = vtanh.f32 %v1547_v27  ;;  %v1651_v44 = vrot.slane %v1547_v27, 6 }
0x2090   :  { %v2604_v13 = vpop.eup %2603 }
0x2091   :  { %1550 = vrot.lane.b32.xlu1 %v2604_v13, %s2813_s5 }
0x2103   :  { %v1551_v30 = vpop.permute.xlu1 %1550 }
0x2104   :  { %v3165_v31 = vmul.f32 %v2602_v21, %v1551_v30 }
0x2106   :  { %v1567_v32 = vrot.slane %v3165_v31, 6 }
0x2108   :  { %1568 = vrot.lane.b32.xlu0 %v1567_v32, %s2802_s15 }
0x217a   :  { %v1569_v33 = vpop.permute.xlu0 %1568 }
0x217b   :  { %2353 = vmatmul.mubr.msk.f32.vlgmr.msra.gmra.mrb[12].mxu1 %vm106_vm1, %v1569_v33 }
0x217c   :  { %2482 = vmatpush3.bf16.msra.mxu1 %v3076_v53  ;;  %2374 = vmatprep.mubr.msk.f32.mxu1 %vm2811_vm0, %v2812_v1 }
0x217d   :  { %2483 = vmatprep.subr.bf16.mxu1 %v2810_v0 }
0x2180   :  { %2485 = vmatpush3.bf16.msra.mxu1 %v3079_v4 }
0x224e   :  { %v1638_v34 = vpop.f32.mrb[12].mxu1 }
0x224f   :  { %v1642_v35 = vadd.f32 %v1638_v34, %v3112_v11  ;;  %v2354_v36 = vpop.f32.mrb[13].mxu1 }
0x2251   :  { %2605 = vtanh.f32 %v1642_v35  ;;  %v2108_v38 = vmul.f32 -1.442695, %v1642_v35 }
0x2253   :  { %2607 = vpow2.f32 %v2108_v38 }
0x225b   :  { %v2606_v37 = vpop.eup %2605 }
0x225c   :  { %1655 = vrot.lane.b32.xlu1 %v2606_v37, %s2813_s5 }
0x225d   :  { %v2608_v39 = vpop.eup %2607 }
0x225e   :  { %v1646_v40 = vadd.f32 1.0, %v2608_v39 }
0x2260   :  { %2609 = vrcp.f32 %v1646_v40 }
0x226a   :  { %v2610_v29 = vpop.eup %2609 }
0x226b   :  { %v1653_v45 = vmul.f32 %v2610_v29, %v1651_v44  ;;  %v1201_v44 = vlaneseq }
0x22ce   :  { %v1656_v41 = vpop.permute.xlu1 %1655 }
0x22cf   :  { %v1658_v42 = vmul.f32 %v2610_v29, %v1656_v41  ;;  %v2814_v41 = vmov 1983009808  }
0x22d1   :  { %1660 = vrot.lane.b32.xlu0 %v1658_v42, %s2802_s15  ;;  %v1199_v42 = vunpack.c.l.s4 %v2814_v41 }
0x2343   :  { %v1661_v46 = vpop.permute.xlu0 %1660 }
0x2344   :  { %v1663_v26 = vadd.f32 %v1661_v46, %v1653_v45  ;;  %v1200_v45 = vunpack.c.0.s8 %v1199_v42  ;;  %v1202_v46 = vshrl.u32 %v1201_v44, 7 }
0x2346   :  { %2611 = vtanh.f32 %v1663_v26 }
0x2350   :  { %v2612_v48 = vpop.eup %2611 }
0x2351   :  { %1666 = vrot.lane.b32.xlu1 %v2612_v48, %s2813_s5 }
0x23c3   :  { %v1667_v49 = vpop.permute.xlu1 %1666 }
0x23c4   :  { %v3179_v50 = vmul.f32 %v2610_v29, %v1667_v49  ;;  %v1203_v49 = vsub.s32 %v1200_v45, %v1202_v46 }
0x23c6   :  { %1682 = vrot.lane.b32.xlu0 %v3179_v50, %s2802_s15 }
0x2438   :  { %v1683_v51 = vpop.permute.xlu0 %1682 }
0x2439   :  { %2364 = vmatmul.mubr.msk.f32.vlgmr.msra.gmra.mrb[14].mxu0 %vm106_vm1, %v1683_v51 }
0x243a   :  { %2488 = vmatpush3.bf16.msra.mxu0 %v3076_v53  ;;  %2385 = vmatprep.mubr.msk.f32.mxu0 %vm2811_vm0, %v2812_v1 }
0x243b   :  { %2489 = vmatprep.subr.bf16.mxu0 %v2810_v0  ;;  %v1768_v0 = vrot.slane %v1663_v26, 6 }
0x243e   :  { %2491 = vmatpush3.bf16.msra.mxu0 %v3079_v4 }
0x250c   :  { %v1752_v52 = vpop.f32.mrb[14].mxu0 }
0x250d   :  { %v1757_v54 = vrot.slane %v1752_v52, 6  ;;  %v2365_v5 = vpop.f32.mrb[15].mxu0 }
0x250f   :  { %v1759_v55 = vadd.f32 %v1757_v54, %v3112_v11 }
0x2511   :  { %2613 = vtanh.f32 %v1759_v55  ;;  %v2110_v57 = vmul.f32 -1.442695, %v1759_v55 }
0x2513   :  { %2615 = vpow2.f32 %v2110_v57 }
0x251b   :  { %v2614_v56 = vpop.eup %2613 }
0x251c   :  { %1772 = vrot.lane.b32.xlu1 %v2614_v56, %s2813_s5 }
0x251d   :  { %v2616_v58 = vpop.eup %2615 }
0x251e   :  { %v1763_v53 = vadd.f32 1.0, %v2616_v58 }
0x2520   :  { %2617 = vrcp.f32 %v1763_v53 }
0x252a   :  { %v2618_v7 = vpop.eup %2617 }
0x252b   :  { %v1770_v4 = vmul.f32 %v2618_v7, %v1768_v0 }
0x258e   :  { %v1773_v1 = vpop.permute.xlu1 %1772 }
0x258f   :  { %v1775_v59 = vmul.f32 %v2618_v7, %v1773_v1  ;;  %v1321_v1 = vrot.slane %v3135_v47, %v1203_v49  ;;  %v1555_v47 = vcombine.high %v3165_v31, %v3165_v31 }
0x2591   :  { %1777 = vrot.lane.b32.xlu0 %v1775_v59, %s2802_s15  ;;  %v1677_v59 = vrot.slane %v3179_v50, %v1203_v49  ;;  %v1322_v0 = vcombine.high %v1321_v1, %v1321_v1 }
0x2603   :  { %v1778_v60 = vpop.permute.xlu0 %1777 }
0x2604   :  { %v1780_v61 = vadd.f32 %v1778_v60, %v1770_v4  ;;  %v1435_v4 = vcombine.high %v3150_v6, %v3150_v6 }
0x2606   :  { %2619 = vtanh.f32 %v1780_v61  ;;  %v1887_v23 = vrot.slane %v1780_v61, 6  ;;  %v1442_v60 = vrot.slane %v1435_v4, %v1203_v49 }
0x2610   :  { %v2620_v62 = vpop.eup %2619 }
0x2611   :  { %1783 = vrot.lane.b32.xlu1 %v2620_v62, %s2813_s5 }
0x2683   :  { %v1784_v63 = vpop.permute.xlu1 %1783 }
0x2684   :  { %v1786_v2 = vmul.f32 %v2618_v7, %v1784_v63 }
0x2686   :  { %v1800_v3 = vrot.slane %v1786_v2, 2  ;;  %v1794_v52 = vrot.slane %v1786_v2, %v1203_v49 }
0x2688   :  { %1801 = vrot.lane.b32.xlu0 %v1800_v3, %s2802_s15  ;;  %v1795_v54 = vcombine.high %v1794_v52, %v1794_v52 }
0x26fa   :  { %v1802_v8 = vpop.permute.xlu0 %1801 }
0x26fb   :  { %2375 = vmatmul.mubr.msk.f32.vlgmr.msra.gmra.mrb[14].mxu1 %vm106_vm1, %v1802_v8 }
0x27ce   :  { %v1871_v10 = vpop.f32.mrb[14].mxu1 }
0x27cf   :  { %v1876_v12 = vrot.slane %v1871_v10, 4  ;;  %v2376_v14 = vpop.f32.mrb[15].mxu1  ;;  %v1562_v10 = vrot.slane %v1555_v47, %v1203_v49 }
0x27d1   :  { %v1878_v15 = vadd.f32 %v1876_v12, %v3112_v11  ;;  %v1563_v14 = vcombine.high %v1562_v10, %v1562_v10 }
0x27d3   :  { %2621 = vtanh.f32 %v1878_v15  ;;  %v2112_v17 = vmul.f32 -1.442695, %v1878_v15 }
0x27d5   :  { %2623 = vpow2.f32 %v2112_v17 }
0x27dd   :  { %v2622_v16 = vpop.eup %2621 }
0x27de   :  { %1891 = vrot.lane.b32.xlu1 %v2622_v16, %s2813_s5 }
0x27df   :  { %v2624_v18 = vpop.eup %2623 }
0x27e0   :  { %v1882_v19 = vadd.f32 1.0, %v2624_v18 }
0x27e2   :  { %2625 = vrcp.f32 %v1882_v19 }
0x27ec   :  { %v2626_v20 = vpop.eup %2625 }
0x27ed   :  { %v1889_v24 = vmul.f32 %v2626_v20, %v1887_v23 }
0x2850   :  { %v1892_v21 = vpop.permute.xlu1 %1891 }
0x2851   :  { %v1894_v22 = vmul.f32 %v2626_v20, %v1892_v21 }
0x2853   :  { %1896 = vrot.lane.b32.xlu0 %v1894_v22, %s2802_s15 }
0x28c5   :  { %v1897_v9 = vpop.permute.xlu0 %1896 }
0x28c6   :  { %v1899_v25 = vadd.f32 %v1897_v9, %v1889_v24 }
0x28c8   :  { %2627 = vtanh.f32 %v1899_v25  ;;  %v2006_v56 = vrot.slane %v1899_v25, 6 }
0x28d2   :  { %v2628_v27 = vpop.eup %2627 }
0x28d3   :  { %1902 = vrot.lane.b32.xlu1 %v2628_v27, %s2813_s5 }
0x2945   :  { %v1903_v13 = vpop.permute.xlu1 %1902 }
0x2946   :  { %v1905_v30 = vmul.f32 %v2626_v20, %v1903_v13 }
0x2948   :  { %v1919_v32 = vrot.slane %v1905_v30, 4  ;;  %v1907_v5 = vcombine.high %v1905_v30, %v1905_v30 }
0x294a   :  { %1920 = vrot.lane.b32.xlu0 %v1919_v32, %s2802_s15  ;;  %v1914_v55 = vrot.slane %v1907_v5, %v1203_v49 }
0x29bc   :  { %v1921_v33 = vpop.permute.xlu0 %1920 }
0x29bd   :  { %2386 = vmatmul.mubr.msk.f32.vlgmr.msra.gmra.mrb[16].mxu0 %vm106_vm1, %v1921_v33 }
0x2a90   :  { %v1990_v34 = vpop.f32.mrb[16].mxu0 }
0x2a91   :  { %v1995_v35 = vrot.slane %v1990_v34, 2  ;;  %v2387_v36 = vpop.f32.mrb[17].mxu0 }
0x2a93   :  { %v1997_v37 = vadd.f32 %v1995_v35, %v3112_v11  ;;  %v1204_v11 = vrot.slane %v3120_v28, %v1203_v49 }
0x2a95   :  { %2629 = vtanh.f32 %v1997_v37  ;;  %v2114_v39 = vmul.f32 -1.442695, %v1997_v37 }
0x2a97   :  { %2631 = vpow2.f32 %v2114_v39 }
0x2a9f   :  { %v2630_v38 = vpop.eup %2629 }
0x2aa0   :  { %2010 = vrot.lane.b32.xlu1 %v2630_v38, %s2813_s5 }
0x2aa1   :  { %v2632_v40 = vpop.eup %2631 }
0x2aa2   :  { %v2001_v29 = vadd.f32 1.0, %v2632_v40 }
0x2aa4   :  { %2633 = vrcp.f32 %v2001_v29 }
0x2aae   :  { %v2634_v26 = vpop.eup %2633 }
0x2aaf   :  { %v2008_v57 = vmul.f32 %v2634_v26, %v2006_v56 }
0x2b12   :  { %v2011_v48 = vpop.permute.xlu1 %2010 }
0x2b13   :  { %v2013_v51 = vmul.f32 %v2634_v26, %v2011_v48 }
0x2b15   :  { %2015 = vrot.lane.b32.xlu0 %v2013_v51, %s2802_s15 }
0x2b19   :  { %1205 = vrot.lane.b32.xlu0 %v1204_v11, %s2802_s15 }
0x2b1d   :  { %988 = vrot.lane.b32.xlu0 %v3065_v43, %s2802_s15 }
0x2b21   :  { %1796 = vrot.lane.b32.xlu0 %v1795_v54, %s2813_s5 }
0x2b25   :  { %1915 = vrot.lane.b32.xlu0 %v1914_v55, %s2815_s6 }
0x2b87   :  { %v2016_v58 = vpop.permute.xlu0 %2015 }
0x2b88   :  { %v2018_v53 = vadd.f32 %v2016_v58, %v2008_v57 }
0x2b8a   :  { %2635 = vtanh.f32 %v2018_v53  ;;  %2043 = vrot.lane.b32.xlu0 %v2018_v53, %s2813_s5 }
0x2b8b   :  { %v1206_v28 = vpop.permute.xlu0 %1205 }
0x2b8c   :  { %1208 = vst.msk [vmem:[#allocation12] sm:$0x3] %vm213_vm2, %v1206_v28 }
0x2b8f   :  { %v989_v7 = vpop.permute.xlu0 %988 }
0x2b90   :  { %992 = vst.msk [vmem:[#allocation13 - $0x6] sm:$0xc0] %vm991_vm6, %v989_v7 }
0x2b93   :  { %v1797_v61 = vpop.permute.xlu0 %1796 }
0x2b94   :  { %v2636_v43 = vpop.eup %2635 }
0x2b95   :  { %2021 = vrot.lane.b32.xlu1 %v2636_v43, %s2813_s5 }
0x2b97   :  { %v1916_v6 = vpop.permute.xlu0 %1915 }
0x2b99   :  { %1678 = vrot.lane.b32.xlu1 %v1677_v59, %s2802_s15  ;;  %s2816_s15 = smov [#allocation12]  }
0x2b9a   :  { %s2054_s27 = sshll.u32 %s2816_s15, 4  ;;  %s2055_s27 = int_to_ptr.vmem [resolvable:$true] %s2054_s27 }
0x2b9b   :  { %s2747_s29 = scalar_lea.vmem %s2055_s27, 64  ;;  %p2752_p13 = scmp.lt.s32.totalorder %s2055_s27, %s2055_s27 }
0x2b9c   :  { %p2748_p12 = scmp.ne.s32.totalorder %s2055_s27, %s2747_s29  ;;  %p2753_p0 = scmp.lt.s32.totalorder %s2747_s29, %s2747_s29 }
0x2b9d   :  { %1323 = vrot.lane.b32.xlu1 %v1322_v0, %s2813_s5 }
0x2b9e   :  { %p2754_p1 = por %p2753_p0, %p2752_p13 }
0x2ba0   :  { %p2755_p2 = pnand %p2754_p1, %p2748_p12 }
0x2ba1   :  { %1443 = vrot.lane.b32.xlu1 %v1442_v60, %s2815_s6 }
0x2c07   :  { %v2022_v62 = vpop.permute.xlu1 %2021 }
0x2c08   :  { %v2024_v63 = vmul.f32 %v2634_v26, %v2022_v62 }
0x2c0a   :  { %v2026_v2 = vcombine.high %v2024_v63, %v2024_v63  ;;  %2037 = vrot.lane.b32.xlu1 %v2024_v63, %s2813_s5 }
0x2c0b   :  { %v1679_v50 = vpop.permute.xlu1 %1678 }
0x2c0c   :  { %v2033_v3 = vrot.slane %v2026_v2, %v1203_v49  ;;  %1681 = vst.msk [vmem:[#allocation12 + $0x2] sm:$0x3] %vm213_vm2, %v1679_v50 }
0x2c0d   :  { %1799 = vst.msk [vmem:[#allocation12 + $0x2] sm:$0x3] %vm1326_vm7, %v1797_v61 }
0x2c0e   :  { %v2034_v8 = vcombine.high %v2033_v3, %v2033_v3  ;;  %1918 = vst.msk [vmem:[#allocation12 + $0x2] sm:$0x3] %vm1446_vm8, %v1916_v6 }
0x2c0f   :  { %v1324_v12 = vpop.permute.xlu1 %1323 }
0x2c10   :  { %1327 = vst.msk [vmem:[#allocation12] sm:$0x3] %vm1326_vm7, %v1324_v12 }
0x2c11   :  { %2036 = vst.msk [vmem:[#allocation12 + $0x2] sm:$0x3] %vm1565_vm9, %v2034_v8 }
0x2c13   :  { %v1444_v15 = vpop.permute.xlu1 %1443 }
0x2c14   :  { %1447 = vst.msk [vmem:[#allocation12] sm:$0x3] %vm1446_vm8, %v1444_v15 }
0x2c15   :  { %1566 = vst.msk [vmem:[#allocation12] sm:$0x3] %vm1565_vm9, %v1563_v14 }
0x2c16   :  { %2758 = shalt.err (!%p2755_p2)
}
0x2c17   :  { %s2759_s10 = scalar_lea.hbm %s3255_s7, 64 }
0x2c18   :  { %p2760_p3 = scmp.ne.s32.totalorder %s3255_s7, %s2759_s10  ;;  %p2763_p4 = scmp.lt.u32.totalorder %s2759_s10, %s3255_s7 }
0x2c1a   :  { %p2765_p5 = pnand %p2763_p4, %p2760_p3 }
0x2c1c   :  { %2768 = shalt.err (!%p2765_p5)
}
0x2c1d   :  { %2057 = dma.vmem_to_hbm [thread:$0]  %s2055_s27, 64, %s3255_s7, [#allocation5]   ;;  %vm2040_vm10 = vcmask 523526   ;;  %vm2046_vm11 = vcmask 1048326   ;;  %v2044_v16 = vpop.permute.xlu0 %2043 }
0x2c1e   :  { %s2817_s16 = smov [#allocation13]  }
0x2c1f   :  { %s2064_s17 = sshll.u32 %s2817_s16, 4  ;;  %s2065_s17 = int_to_ptr.vmem [resolvable:$true] %s2064_s17 }
0x2c20   :  { %s2769_s18 = scalar_lea.vmem %s2065_s17, 32  ;;  %p2774_p7 = scmp.lt.s32.totalorder %s2065_s17, %s2065_s17 }
0x2c21   :  { %p2770_p6 = scmp.ne.s32.totalorder %s2065_s17, %s2769_s18  ;;  %p2775_p8 = scmp.lt.s32.totalorder %s2769_s18, %s2769_s18 }
0x2c23   :  { %p2776_p9 = por %p2775_p8, %p2774_p7 }
0x2c25   :  { %p2777_p10 = pnand %p2776_p9, %p2770_p6 }
0x2c7c   :  { %v2038_v31 = vpop.permute.xlu1 %2037 }
0x2c7d   :  { %2041 = vst.msk [vmem:[#allocation13 - $0x6] sm:$0xc0] %vm2040_vm10, %v2038_v31 }
0x2c7e   :  { %2047 = vst.msk [vmem:[#allocation13 - $0x6] sm:$0xc0] %vm2046_vm11, %v2044_v16 }
0x2c7f   :  { %2780 = shalt.err (!%p2777_p10)
}
0x2c80   :  { %s2781_s7 = scalar_lea.hbm %s3256_s8, 32 }
0x2c81   :  { %p2782_p11 = scmp.ne.s32.totalorder %s3256_s8, %s2781_s7  ;;  %p2785_p12 = scmp.lt.u32.totalorder %s2781_s7, %s3256_s8 }
0x2c83   :  { %p2787_p13 = pnand %p2785_p12, %p2782_p11 }
0x2c85   :  { %2790 = shalt.err (!%p2787_p13)
}
0x2c86   :  { %2067 = dma.vmem_to_hbm [thread:$0]  %s2065_s17, 32, %s3256_s8, [#allocation14]  }
0x2c87   :  { %2797 = dma.done.wait [#allocation5], 64  }
0x2c88   :  { %2798 = vsyncadd [#allocation5], 4294967232 }
0x2c89   :  { %2799 = dma.done.wait [#allocation14], 32  }
0x2c8a   :  { %2800 = vsyncadd [#allocation14], 4294967264 }
0x2c8b   :  { %2074 = vsyncpa [#allocation4], 1 }
0x2c8c   :  { %2075 = vsyncpa [#allocation7], 1 }
0x2c8d   :  { %2076 = vsyncpa [#allocation10], 1 }
0x2c8e   :  { %2077 = vsyncpa [#allocation5], 1 }
0x2c8f   :  { %2078 = vsyncpa [#allocation14], 1 }

</bundles_post_ra>
